<compile_context>
chip_gen: v7x
topology: tpu7x:2x2x1
jax: 0.10.0
libtpu: 0.0.40
codegen_flags: <defaults>
</compile_context>

<pallas_src>
import functools

import jax
import jax.numpy as jnp
from jax.experimental import pallas as pl
from jax.experimental.pallas import tpu as pltpu

LANE = 128


def _round_up(x, m):
    return (x + m - 1) // m * m


# ---------------------------------------------------------------------------
# Small-graph fast path: everything fused in a single grid point.
# ---------------------------------------------------------------------------
def fused_small_kernel(h_ref, w_ref, adj_ref, b_ref, out_ref):
    hw = jnp.dot(h_ref[...], w_ref[...], preferred_element_type=jnp.float32)
    adj = adj_ref[...]                                           # bf16
    neigh = jnp.dot(adj, hw.astype(jnp.bfloat16),
                    preferred_element_type=jnp.float32)
    deg = jnp.sum(adj.astype(jnp.float32), axis=-1, keepdims=True)
    # Exact divide; zero-in-degree (or padded) rows get h_neigh = 0.  The
    # inner where keeps the masked branch finite (no 0*inf -> NaN).
    inv = jnp.where(deg > 0.0, 0.2 / jnp.where(deg > 0.0, deg, 1.0), 0.0)
    z = 0.8 * hw + neigh * inv + b_ref[...]
    out_ref[...] = jax.nn.sigmoid(z).astype(out_ref.dtype)


def _weighted_gcn_small(adj, feats, weight_t, bias, n_pad, fin_pad, fout_pad):
    n, fin = feats.shape
    fout = weight_t.shape[1]

    adj_p = jnp.zeros((n_pad, n_pad), jnp.bfloat16).at[:n, :n].set(
        adj.astype(jnp.bfloat16))
    h_p = jnp.zeros((n_pad, fin_pad), jnp.float32).at[:n, :fin].set(
        feats.astype(jnp.float32))
    w_p = jnp.zeros((fin_pad, fout_pad), jnp.float32).at[:fin, :fout].set(
        weight_t.astype(jnp.float32))
    b_p = jnp.zeros((1, fout_pad), jnp.float32).at[:, :fout].set(
        bias.astype(jnp.float32))

    out_p = pl.pallas_call(
        fused_small_kernel,
        out_shape=jax.ShapeDtypeStruct((n_pad, fout_pad), jnp.float32),
        grid_spec=pltpu.PrefetchScalarGridSpec(
            num_scalar_prefetch=0,
            grid=(1,),
            in_specs=[
                pl.BlockSpec((n_pad, fin_pad), lambda i: (0, 0)),
                pl.BlockSpec((fin_pad, fout_pad), lambda i: (0, 0)),
                pl.BlockSpec((n_pad, n_pad), lambda i: (0, 0)),
                pl.BlockSpec((1, fout_pad), lambda i: (0, 0)),
            ],
            out_specs=pl.BlockSpec((n_pad, fout_pad), lambda i: (0, 0)),
        ),
    )(h_p, w_p, adj_p, b_p)
    return out_p[:n, :fout]


# ---------------------------------------------------------------------------
# General path, stage 1: node-feature projection HW = H @ W, plus a "ones"
# column at index `ones_col` so the degree later falls out of the MXU.
# ---------------------------------------------------------------------------
def project_kernel(h_ref, w_ref, hw_ref, *, ones_col):
    hw = jnp.dot(h_ref[...], w_ref[...], preferred_element_type=jnp.float32)
    col = jax.lax.broadcasted_iota(jnp.int32, hw.shape, 1)
    hw_ref[...] = jnp.where(col == ones_col, 1.0, hw).astype(hw_ref.dtype)


# ---------------------------------------------------------------------------
# General path, stage 2: weighted-mean aggregation + blend + bias + sigmoid.
#   grid = (dest-node row blocks [parallel], source-node K blocks [arbitrary])
# ---------------------------------------------------------------------------
def _make_agg_kernel(tk, ones_col, hw_resident):
    def kernel(adj_ref, hw_src_ref, hw_dst_ref, b_ref, out_ref, acc_ref):
        k = pl.program_id(1)

        @pl.when(k == 0)
        def _():
            acc_ref[...] = jnp.zeros_like(acc_ref)

        if hw_resident:
            off = pl.multiple_of(k * tk, tk)
            hw_blk = hw_src_ref[pl.ds(off, tk), :]
        else:
            hw_blk = hw_src_ref[...]
        # bf16 A tile x bf16 HW tile, f32 accumulation on the MXU.  The
        # "ones" column of HW makes acc[:, ones_col] the weighted in-degree.
        acc_ref[...] += jnp.dot(adj_ref[...], hw_blk.astype(jnp.bfloat16),
                                preferred_element_type=jnp.float32)

        @pl.when(k == pl.num_programs(1) - 1)
        def _():
            acc = acc_ref[...]
            deg = acc[:, ones_col:ones_col + 1]
            # Exact divide (once per row block, negligible cost).  Rows with
            # zero total in-weight (isolated or padded) get h_neigh = 0; the
            # inner where keeps the masked branch finite (no 0*inf -> NaN).
            inv = jnp.where(deg > 0.0,
                            0.2 / jnp.where(deg > 0.0, deg, 1.0),
                            0.0)
            z = 0.8 * hw_dst_ref[...] + acc * inv + b_ref[...]
            out_ref[...] = jax.nn.sigmoid(z).astype(out_ref.dtype)

    return kernel


def weighted_gcn(adj, feats, weight_t, bias, *, tile_n=512, small_limit=1024):
    """adj: (N, N) f32 with adj[v, u] = weight of edge u->v; feats: (N, Fin);
    weight_t: (Fin, Fout) (pre-transposed nn.Linear weight); bias: (1, Fout)."""
    n, fin = feats.shape
    fout = weight_t.shape[1]
    fin_pad = _round_up(fin, LANE)
    fout_pad = _round_up(fout, LANE)

    # ---- small-graph fused fast path --------------------------------------
    n_small = _round_up(n, LANE)
    small_bytes = (n_small * n_small * 2 + n_small * fin_pad * 4
                   + fin_pad * fout_pad * 4 + 3 * n_small * fout_pad * 4)
    if n_small <= small_limit and small_bytes <= 12 * 1024 * 1024:
        return _weighted_gcn_small(adj, feats, weight_t, bias,
                                   n_small, fin_pad, fout_pad)

    # ---- general tiled path ------------------------------------------------
    tn = tile_n                       # one tile size for both A dims (no lcm)
    n_pad = _round_up(n, tn)          # small path covers n <= ~1024, so the
    #                                   row (parallel) axis always has >= 2
    #                                   blocks here -> both v7x TCs get work.
    fout_ext = _round_up(fout + 1, LANE)   # +1 spare "ones" column for degree
    ones_col = fout

    # Pad + downcast A in one pass (the bf16 downcast pays for the extra
    # HBM pass by halving every subsequent kernel read of A).
    adj_p = jnp.zeros((n_pad, n_pad), jnp.bfloat16).at[:n, :n].set(
        adj.astype(jnp.bfloat16))
    h_p = jnp.zeros((n_pad, fin_pad), jnp.float32).at[:n, :fin].set(
        feats.astype(jnp.float32))
    w_p = jnp.zeros((fin_pad, fout_ext), jnp.float32).at[:fin, :fout].set(
        weight_t.astype(jnp.float32))
    b_p = jnp.zeros((1, fout_ext), jnp.float32).at[:, :fout].set(
        bias.astype(jnp.float32))

    # --- Stage 1: HW = H @ W (f32, lane-dense, with the ones column) -------
    tm1 = 256
    hw = pl.pallas_call(
        functools.partial(project_kernel, ones_col=ones_col),
        out_shape=jax.ShapeDtypeStruct((n_pad, fout_ext), jnp.float32),
        grid_spec=pltpu.PrefetchScalarGridSpec(
            num_scalar_prefetch=0,
            grid=(n_pad // tm1,),
            in_specs=[
                pl.BlockSpec((tm1, fin_pad), lambda i: (i, 0)),
                pl.BlockSpec((fin_pad, fout_ext), lambda i: (0, 0)),
            ],
            out_specs=pl.BlockSpec((tm1, fout_ext), lambda i: (i, 0)),
        ),
        compiler_params=pltpu.CompilerParams(
            dimension_semantics=("parallel",)),
    )(h_p, w_p)

    # --- Stage 2: aggregate A @ HW over source blocks, finalize ------------
    tm = tk = tn
    hw_bytes = n_pad * fout_ext * 4
    # Keep HW(src) fully resident in VMEM when it fits (budget keeps the
    # double-buffered copy under ~24 MiB -> safe for v7x's 64 MiB VMEM).
    resident = hw_bytes <= 12 * 1024 * 1024

    if resident:
        hw_src_spec = pl.BlockSpec((n_pad, fout_ext), lambda i, k: (0, 0))
        hw_src_bytes = 2 * hw_bytes
    else:
        hw_src_spec = pl.BlockSpec((tk, fout_ext), lambda i, k: (k, 0))
        hw_src_bytes = 2 * tk * fout_ext * 4

    need = (hw_src_bytes
            + 2 * tm * tk * 2            # A tiles, double-buffered, bf16
            + 2 * tm * fout_ext * 4      # hw_dst buffers
            + 2 * tm * fout_ext * 4      # out buffers
            + tm * fout_ext * 4)         # accumulator scratch
    vmem_limit = int(min(max(need + (8 << 20), 32 << 20), 48 << 20))

    out_p = pl.pallas_call(
        _make_agg_kernel(tk, ones_col, resident),
        out_shape=jax.ShapeDtypeStruct((n_pad, fout_ext), jnp.float32),
        grid_spec=pltpu.PrefetchScalarGridSpec(
            num_scalar_prefetch=0,
            grid=(n_pad // tm, n_pad // tk),
            in_specs=[
                pl.BlockSpec((tm, tk), lambda i, k: (i, k)),          # A tile
                hw_src_spec,                                          # HW src
                pl.BlockSpec((tm, fout_ext), lambda i, k: (i, 0)),    # HW dst
                pl.BlockSpec((1, fout_ext), lambda i, k: (0, 0)),     # bias
            ],
            out_specs=pl.BlockSpec((tm, fout_ext), lambda i, k: (i, 0)),
            scratch_shapes=[
                pltpu.VMEM((tm, fout_ext), jnp.float32),  # neighbor+deg acc
            ],
        ),
        compiler_params=pltpu.CompilerParams(
            dimension_semantics=("parallel", "arbitrary"),
            vmem_limit_bytes=vmem_limit),
    )(adj_p, hw, hw, b_p)

    return out_p[:n, :fout]


def _init_params(key, in_feats, out_feats):
    kw, kb = jax.random.split(key)
    # torch.nn.init.xavier_uniform_ on weight of shape (out_feats, in_feats)
    limit = (6.0 / (in_feats + out_feats)) ** 0.5
    weight = jax.random.uniform(kw, (out_feats, in_feats), jnp.float32,
                                -limit, limit)
    # PyTorch nn.Linear default bias init: U(-1/sqrt(fan_in), 1/sqrt(fan_in))
    bound = 1.0 / (in_feats ** 0.5)
    bias = jax.random.uniform(kb, (out_feats,), jnp.float32, -bound, bound)
    return weight, bias


if __name__ == "__main__":
    key = jax.random.PRNGKey(0)

    def make_case(k, n, in_feats, out_feats, density=0.3):
        k_adj, k_mask, k_feat, k_param = jax.random.split(k, 4)
        w_edges = jax.random.uniform(k_adj, (n, n), jnp.float32, 0.1, 1.0)
        mask = (jax.random.uniform(k_mask, (n, n)) < density).astype(jnp.float32)
        adj = w_edges * mask                  # A[v, u] = weight of edge u -> v
        feats = jax.random.normal(k_feat, (n, in_feats), jnp.float32)
        weight, bias = _init_params(k_param, in_feats, out_feats)
        return adj, feats, weight.T, bias.reshape(1, out_feats)

    def reference(adj, feats, weight_t, bias2d):
        # Plain-JAX reference with the original association; h_neigh = 0 for
        # zero-in-degree nodes.
        deg = jnp.sum(adj, axis=-1, keepdims=True)
        h_neigh = jnp.where(deg > 0, (adj @ feats) / jnp.where(deg > 0, deg, 1.0), 0.0)
        agg = 0.8 * feats + 0.2 * h_neigh
        return jax.nn.sigmoid(agg @ weight_t + bias2d)

    k1, k2 = jax.random.split(key)

    # Case 1: small graph (N=200, Fin=48, Fout=24) -> fused fast path.
    adj, feats, weight_t, bias2d = make_case(k1, 200, 48, 24)
    out = jax.block_until_ready(weighted_gcn(adj, feats, weight_t, bias2d))
    ref = reference(adj, feats, weight_t, bias2d)
    err1 = float(jnp.max(jnp.abs(out - ref)))
    assert jnp.allclose(out, ref, atol=5e-3, rtol=5e-3), err1

    # Case 2: larger graph (N=1300) -> exercises the tiled bf16-A general path.
    adj, feats, weight_t, bias2d = make_case(k2, 1300, 48, 24)
    out = jax.block_until_ready(weighted_gcn(adj, feats, weight_t, bias2d))
    ref = reference(adj, feats, weight_t, bias2d)
    err2 = float(jnp.max(jnp.abs(out - ref)))
    assert jnp.allclose(out, ref, atol=5e-3, rtol=5e-3), err2

    print("KERNEL_OK")
</pallas_src>

<mosaic_0001>
module attributes {stable_mosaic.version = 11 : i64} {
  func.func @fused_small_kernel(%arg0: i32, %arg1: memref<256x128xf32, #tpu.memory_space<vmem>>, %arg2: memref<128x128xf32, #tpu.memory_space<vmem>>, %arg3: memref<256x256xbf16, #tpu.memory_space<vmem>>, %arg4: memref<1x128xf32, #tpu.memory_space<vmem>>, %arg5: memref<256x128xf32, #tpu.memory_space<vmem>>) attributes {dimension_semantics = [#tpu.dimension_semantics<arbitrary>], iteration_bounds = array<i64: 1>, scalar_prefetch = 0 : i64, scratch_operands = 0 : i64, tpu.core_type = #tpu.core_type<tc>, window_params = [{pipeline_mode = #tpu.pipeline_mode<synchronous>, transform_indices = @transform_0, window_bounds = array<i64: 256, 128>}, {pipeline_mode = #tpu.pipeline_mode<synchronous>, transform_indices = @transform_1, window_bounds = array<i64: 128, 128>}, {pipeline_mode = #tpu.pipeline_mode<synchronous>, transform_indices = @transform_2, window_bounds = array<i64: 256, 256>}, {pipeline_mode = #tpu.pipeline_mode<synchronous>, transform_indices = @transform_3, window_bounds = array<i64: 1, 128>}, {pipeline_mode = #tpu.pipeline_mode<synchronous>, transform_indices = @transform_4, window_bounds = array<i64: 256, 128>}]} {
    %c0 = arith.constant 0 : index
    %c0_0 = arith.constant 0 : index
    %0 = vector.load %arg1[%c0, %c0_0] : memref<256x128xf32, #tpu.memory_space<vmem>>, vector<256x128xf32>
    %c0_1 = arith.constant 0 : index
    %c0_2 = arith.constant 0 : index
    %1 = vector.load %arg2[%c0_1, %c0_2] : memref<128x128xf32, #tpu.memory_space<vmem>>, vector<128x128xf32>
    %cst = arith.constant dense<0.000000e+00> : vector<256x128xf32>
    %2 = tpu.matmul %0, %1, %cst {dimension_numbers = #tpu.dot_dimension_numbers<[1], [0], [0], [1], [0, 0, 1, 1], [], []>} : vector<256x128xf32>, vector<128x128xf32>, vector<256x128xf32> -> vector<256x128xf32>
    %c0_3 = arith.constant 0 : index
    %c0_4 = arith.constant 0 : index
    %3 = vector.load %arg3[%c0_3, %c0_4] : memref<256x256xbf16, #tpu.memory_space<vmem>>, vector<256x256xbf16>
    %4 = arith.truncf %2 : vector<256x128xf32> to vector<256x128xbf16>
    %cst_5 = arith.constant dense<0.000000e+00> : vector<256x128xf32>
    %5 = tpu.matmul %3, %4, %cst_5 {dimension_numbers = #tpu.dot_dimension_numbers<[1], [0], [0], [1], [0, 0, 1, 1], [], []>} : vector<256x256xbf16>, vector<256x128xbf16>, vector<256x128xf32> -> vector<256x128xf32>
    %6 = arith.extf %3 : vector<256x256xbf16> to vector<256x256xf32>
    %cst_6 = arith.constant dense<0.000000e+00> : vector<256xf32>
    %7 = vector.multi_reduction <add>, %6, %cst_6 [1] : vector<256x256xf32> to vector<256xf32>
    %8 = vector.shape_cast %7 : vector<256xf32> to vector<256x1xf32>
    %cst_7 = arith.constant 0.000000e+00 : f32
    %9 = vector.broadcast %cst_7 : f32 to vector<256x1xf32>
    %10 = arith.cmpf ogt, %8, %9 : vector<256x1xf32>
    %cst_8 = arith.constant 0.000000e+00 : f32
    %11 = vector.broadcast %cst_8 : f32 to vector<256x1xf32>
    %12 = arith.cmpf ogt, %8, %11 : vector<256x1xf32>
    %cst_9 = arith.constant 1.000000e+00 : f32
    %13 = vector.broadcast %cst_9 : f32 to vector<256x1xf32>
    %14 = arith.select %12, %8, %13 : vector<256x1xi1>, vector<256x1xf32>
    %cst_10 = arith.constant 2.000000e-01 : f32
    %15 = vector.broadcast %cst_10 : f32 to vector<256x1xf32>
    %16 = arith.divf %15, %14 : vector<256x1xf32>
    %cst_11 = arith.constant 0.000000e+00 : f32
    %17 = vector.broadcast %cst_11 : f32 to vector<256x1xf32>
    %18 = arith.select %10, %16, %17 : vector<256x1xi1>, vector<256x1xf32>
    %cst_12 = arith.constant 8.000000e-01 : f32
    %19 = vector.broadcast %cst_12 : f32 to vector<256x128xf32>
    %20 = arith.mulf %19, %2 : vector<256x128xf32>
    %21 = vector.broadcast %18 : vector<256x1xf32> to vector<256x128xf32>
    %22 = arith.mulf %5, %21 : vector<256x128xf32>
    %23 = arith.addf %20, %22 : vector<256x128xf32>
    %c0_13 = arith.constant 0 : index
    %c0_14 = arith.constant 0 : index
    %24 = vector.load %arg4[%c0_13, %c0_14] : memref<1x128xf32, #tpu.memory_space<vmem>>, vector<1x128xf32>
    %25 = vector.broadcast %24 : vector<1x128xf32> to vector<256x128xf32>
    %26 = arith.addf %23, %25 : vector<256x128xf32>
    %27 = arith.negf %26 : vector<256x128xf32>
    %28 = math.exp %27 : vector<256x128xf32>
    %cst_15 = arith.constant 1.000000e+00 : f32
    %29 = vector.broadcast %cst_15 : f32 to vector<256x128xf32>
    %30 = arith.addf %29, %28 : vector<256x128xf32>
    %31 = arith.divf %29, %30 : vector<256x128xf32>
    %c0_16 = arith.constant 0 : index
    %c0_17 = arith.constant 0 : index
    %32 = vector.load %arg5[%c0_16, %c0_17] : memref<256x128xf32, #tpu.memory_space<vmem>>, vector<256x128xf32>
    tpu.vector_store %arg5[%c0_16, %c0_17], %31 {strides = array<i32>} : memref<256x128xf32, #tpu.memory_space<vmem>>, vector<256x128xf32>,
    return
  }
  func.func @transform_0(%arg0: i32) -> (i32, i32) {
    %c0_i32 = arith.constant 0 : i32
    %c0_i32_0 = arith.constant 0 : i32
    %c0_i32_1 = arith.constant 0 : i32
    return %c0_i32, %c0_i32_0 : i32, i32
  }
  func.func @transform_1(%arg0: i32) -> (i32, i32) {
    %c0_i32 = arith.constant 0 : i32
    %c0_i32_0 = arith.constant 0 : i32
    %c0_i32_1 = arith.constant 0 : i32
    return %c0_i32, %c0_i32_0 : i32, i32
  }
  func.func @transform_2(%arg0: i32) -> (i32, i32) {
    %c0_i32 = arith.constant 0 : i32
    %c0_i32_0 = arith.constant 0 : i32
    %c0_i32_1 = arith.constant 0 : i32
    return %c0_i32, %c0_i32_0 : i32, i32
  }
  func.func @transform_3(%arg0: i32) -> (i32, i32) {
    %c0_i32 = arith.constant 0 : i32
    %c0_i32_0 = arith.constant 0 : i32
    %c0_i32_1 = arith.constant 0 : i32
    return %c0_i32, %c0_i32_0 : i32, i32
  }
  func.func @transform_4(%arg0: i32) -> (i32, i32) {
    %c0_i32 = arith.constant 0 : i32
    %c0_i32_0 = arith.constant 0 : i32
    %c0_i32_1 = arith.constant 0 : i32
    return %c0_i32, %c0_i32_0 : i32, i32
  }
}

</mosaic_0001>

<bundles_post_ra>
// kernel: tpu_custom_call.1
= control target key start
LH: loop header
LB: loop body
LE: loop exit
PB: predicated region body
PF: predicated region fallthrough
CT: control target
= control target key end

     0   :  { %9 = vsyncpa [#allocation3], 0  ;;  %s3020_s0 = inlined_call_operand.hbm [shape: f32[256,128], index: 0, kind: input, shape index: {}]   ;;  %s3021_s1 = inlined_call_operand.hbm [shape: f32[128,128], index: 1, kind: input, shape index: {}]   ;;  %s3022_s2 = inlined_call_operand.hbm [shape: bf16[256,256], index: 2, kind: input, shape index: {}]   ;;  %s3023_s3 = inlined_call_operand.vmem [shape: f32[1,128], index: 3, kind: input, shape index: {}]   ;;  %s3024_s4 = inlined_call_operand.hbm [shape: f32[256,128], index: 4, kind: output, shape index: {}]  }
   0x1   :  { %10 = vsyncpa [#allocation6], 0 }
   0x2   :  { %11 = vsyncpa [#allocation4], 0  ;;  %s2076_s15 = smov [#allocation5]   ;;  %s2077_s17 = smov [#allocation2]  }
   0x3   :  { %s29_s16 = sshll.u32 %s2076_s15, 4  ;;  %s17_s18 = sshll.u32 %s2077_s17, 4  ;;  %s30_s16 = int_to_ptr.vmem [resolvable:$true] %s29_s16  ;;  %s2107_s18 = int_to_ptr.vmem [resolvable:$true] %s17_s18 }
   0x4   :  { %s1982_s21 = scalar_lea.hbm %s3021_s1, 2048 }
   0x5   :  { %p1983_p0 = scmp.ne.s32.totalorder %s3021_s1, %s1982_s21  ;;  %p1986_p1 = scmp.lt.u32.totalorder %s1982_s21, %s3021_s1 }
   0x7   :  { %p1988_p2 = pnand %p1986_p1, %p1983_p0 }
   0x9   :  { %1991 = shalt.err (!%p1988_p2)
}
   0xa   :  { %s1992_s26 = scalar_lea.vmem %s30_s16, 2048  ;;  %p1997_p4 = scmp.lt.s32.totalorder %s30_s16, %s30_s16 }
   0xb   :  { %p1993_p3 = scmp.ne.s32.totalorder %s30_s16, %s1992_s26  ;;  %p1998_p5 = scmp.lt.s32.totalorder %s1992_s26, %s1992_s26 }
   0xd   :  { %p1999_p6 = por %p1998_p5, %p1997_p4 }
   0xf   :  { %p2000_p7 = pnand %p1999_p6, %p1993_p3 }
  0x11   :  { %2003 = shalt.err (!%p2000_p7)
}
  0x12   :  { %s2078_s27 = smov 128   ;;  %s2079_s28 = smov 8  }
  0x13   :  { %35 = dma.hbm_to_vmem [thread:$0]  %s3021_s1, 2048, %s30_s16, [#allocation6], %s2078_s27, %s2078_s27, %s2079_s28  }
  0x14   :  { %s2004_s7 = scalar_lea.hbm %s3020_s0, 4096 }
  0x15   :  { %p2005_p8 = scmp.ne.s32.totalorder %s3020_s0, %s2004_s7  ;;  %p2008_p9 = scmp.lt.u32.totalorder %s2004_s7, %s3020_s0 }
  0x17   :  { %p2010_p10 = pnand %p2008_p9, %p2005_p8 }
  0x19   :  { %2013 = shalt.err (!%p2010_p10)
}
  0x1a   :  { %s2014_s12 = scalar_lea.vmem %s2107_s18, 4096  ;;  %p2019_p12 = scmp.lt.s32.totalorder %s2107_s18, %s2107_s18 }
  0x1b   :  { %p2015_p11 = scmp.ne.s32.totalorder %s2107_s18, %s2014_s12  ;;  %p2020_p13 = scmp.lt.s32.totalorder %s2014_s12, %s2014_s12 }
  0x1d   :  { %p2021_p0 = por %p2020_p13, %p2019_p12 }
  0x1f   :  { %p2022_p1 = pnand %p2021_p0, %p2015_p11 }
  0x21   :  { %2025 = shalt.err (!%p2022_p1)
}
  0x22   :  { %23 = dma.hbm_to_vmem [thread:$0]  %s3020_s0, 4096, %s2107_s18, [#allocation3], %s2078_s27, %s2078_s27, %s2079_s28  }
  0x23   :  { %s2080_s14 = smov [#allocation7]   ;;  %s2026_s19 = scalar_lea.hbm %s3022_s2, 4096 }
  0x24   :  { %s41_s15 = sshll.u32 %s2080_s14, 4  ;;  %p2027_p2 = scmp.ne.s32.totalorder %s3022_s2, %s2026_s19  ;;  %s42_s15 = int_to_ptr.vmem [resolvable:$true] %s41_s15 }
  0x25   :  { %p2030_p3 = scmp.lt.u32.totalorder %s2026_s19, %s3022_s2 }
  0x27   :  { %p2032_p4 = pnand %p2030_p3, %p2027_p2 }
  0x29   :  { %2035 = shalt.err (!%p2032_p4)
}
  0x2a   :  { %s2036_s24 = scalar_lea.vmem %s42_s15, 4096  ;;  %p2041_p6 = scmp.lt.s32.totalorder %s42_s15, %s42_s15 }
  0x2b   :  { %p2037_p5 = scmp.ne.s32.totalorder %s42_s15, %s2036_s24  ;;  %p2042_p7 = scmp.lt.s32.totalorder %s2036_s24, %s2036_s24 }
  0x2d   :  { %p2043_p8 = por %p2042_p7, %p2041_p6 }
  0x2f   :  { %p2044_p9 = pnand %p2043_p8, %p2037_p5 }
  0x31   :  { %2047 = shalt.err (!%p2044_p9)
}
  0x32   :  { %47 = dma.hbm_to_vmem [thread:$0]  %s3022_s2, 4096, %s42_s15, [#allocation6], %s2078_s27, %s2078_s27, %s2079_s28  }
  0x33   :  { %2070 = dma.done.wait [#allocation3], 4096  }
  0x34   :  { %2071 = vsyncadd [#allocation3], 4294963200 }
  0x35   :  { %2072 = dma.done.wait [#allocation6], 6144  }
  0x36   :  { %2073 = vsyncadd [#allocation6], 4294961152  ;;  %v92_v0 = vld [vmem:[#allocation5] sm:$0xff]  ;;  %v93_v1 = vld [vmem:[#allocation5 + $0x8] sm:$0xff] }
  0x37   :  { %v94_v2 = vld [vmem:[#allocation5 + $0x10] sm:$0xff]  ;;  %v1704_v3 = vpack.c.bf16 %v93_v1, %v92_v0  ;;  %v95_v4 = vld [vmem:[#allocation5 + $0x18] sm:$0xff]  ;;  %v96_v6 = vld [vmem:[#allocation5 + $0x20] sm:$0xff] }
  0x38   :  { %v1708_v5 = vpack.c.bf16 %v95_v4, %v94_v2  ;;  %v97_v7 = vld [vmem:[#allocation5 + $0x28] sm:$0xff]  ;;  %v60_v9 = vld [vmem:[#allocation2] sm:$0xff]  ;;  %v98_v10 = vld [vmem:[#allocation5 + $0x30] sm:$0xff] }
  0x39   :  { %1705 = vmatprep.subr.bf16.mxu0 %v1704_v3  ;;  %v1712_v8 = vpack.c.bf16 %v97_v7, %v96_v6  ;;  %v99_v11 = vld [vmem:[#allocation5 + $0x38] sm:$0xff]  ;;  %1656 = vmatprep.mubr.f32.mxu0 %v60_v9  ;;  %v100_v13 = vld [vmem:[#allocation5 + $0x40] sm:$0xff]  ;;  %v101_v14 = vld [vmem:[#allocation5 + $0x48] sm:$0xff] }
  0x3a   :  { %1707 = vmatpush3.bf16.msra.mxu0 %v1704_v3  ;;  %v1716_v12 = vpack.c.bf16 %v99_v11, %v98_v10  ;;  %v1720_v15 = vpack.c.bf16 %v101_v14, %v100_v13  ;;  %v102_v16 = vld [vmem:[#allocation5 + $0x50] sm:$0xff]  ;;  %v103_v17 = vld [vmem:[#allocation5 + $0x58] sm:$0xff]  ;;  %v104_v19 = vld [vmem:[#allocation5 + $0x60] sm:$0xff] }
  0x3b   :  { %1709 = vmatprep.subr.bf16.mxu0 %v1708_v5  ;;  %v1724_v18 = vpack.c.bf16 %v103_v17, %v102_v16  ;;  %v105_v20 = vld [vmem:[#allocation5 + $0x68] sm:$0xff]  ;;  %v106_v22 = vld [vmem:[#allocation5 + $0x70] sm:$0xff]  ;;  %v107_v23 = vld [vmem:[#allocation5 + $0x78] sm:$0xff] }
  0x3c   :  { %v1728_v21 = vpack.c.bf16 %v105_v20, %v104_v19  ;;  %v1732_v24 = vpack.c.bf16 %v107_v23, %v106_v22  ;;  %v61_v25 = vld [vmem:[#allocation2 + $0x8] sm:$0xff]  ;;  %v62_v26 = vld [vmem:[#allocation2 + $0x10] sm:$0xff]  ;;  %v63_v27 = vld [vmem:[#allocation2 + $0x18] sm:$0xff] }
  0x3d   :  { %v64_v28 = vld [vmem:[#allocation2 + $0x20] sm:$0xff]  ;;  %v65_v29 = vld [vmem:[#allocation2 + $0x28] sm:$0xff]  ;;  %v66_v30 = vld [vmem:[#allocation2 + $0x30] sm:$0xff] }
  0x3e   :  { %1711 = vmatpush3.bf16.msra.mxu0 %v1708_v5  ;;  %v67_v31 = vld [vmem:[#allocation2 + $0x38] sm:$0xff]  ;;  %v68_v32 = vld [vmem:[#allocation2 + $0x40] sm:$0xff]  ;;  %v69_v33 = vld [vmem:[#allocation2 + $0x48] sm:$0xff] }
  0x3f   :  { %1713 = vmatprep.subr.bf16.mxu0 %v1712_v8  ;;  %v70_v34 = vld [vmem:[#allocation2 + $0x50] sm:$0xff]  ;;  %v71_v35 = vld [vmem:[#allocation2 + $0x58] sm:$0xff]  ;;  %v72_v36 = vld [vmem:[#allocation2 + $0x60] sm:$0xff] }
  0x40   :  { %v73_v37 = vld [vmem:[#allocation2 + $0x68] sm:$0xff]  ;;  %v74_v38 = vld [vmem:[#allocation2 + $0x70] sm:$0xff]  ;;  %v75_v39 = vld [vmem:[#allocation2 + $0x78] sm:$0xff] }
  0x41   :  { %v76_v40 = vld [vmem:[#allocation2 + $0x80] sm:$0xff]  ;;  %v77_v41 = vld [vmem:[#allocation2 + $0x88] sm:$0xff]  ;;  %v78_v42 = vld [vmem:[#allocation2 + $0x90] sm:$0xff] }
  0x42   :  { %1715 = vmatpush3.bf16.msra.mxu0 %v1712_v8  ;;  %v79_v43 = vld [vmem:[#allocation2 + $0x98] sm:$0xff]  ;;  %v80_v44 = vld [vmem:[#allocation2 + $0xa0] sm:$0xff]  ;;  %v81_v45 = vld [vmem:[#allocation2 + $0xa8] sm:$0xff] }
  0x43   :  { %1717 = vmatprep.subr.bf16.mxu0 %v1716_v12  ;;  %v82_v46 = vld [vmem:[#allocation2 + $0xb0] sm:$0xff]  ;;  %v83_v47 = vld [vmem:[#allocation2 + $0xb8] sm:$0xff]  ;;  %v84_v48 = vld [vmem:[#allocation2 + $0xc0] sm:$0xff] }
  0x44   :  { %v85_v49 = vld [vmem:[#allocation2 + $0xc8] sm:$0xff]  ;;  %v86_v50 = vld [vmem:[#allocation2 + $0xd0] sm:$0xff]  ;;  %v87_v51 = vld [vmem:[#allocation2 + $0xd8] sm:$0xff] }
  0x45   :  { %v88_v52 = vld [vmem:[#allocation2 + $0xe0] sm:$0xff]  ;;  %v89_v53 = vld [vmem:[#allocation2 + $0xe8] sm:$0xff]  ;;  %v90_v54 = vld [vmem:[#allocation2 + $0xf0] sm:$0xff] }
  0x46   :  { %1719 = vmatpush3.bf16.msra.mxu0 %v1716_v12  ;;  %v91_v55 = vld [vmem:[#allocation2 + $0xf8] sm:$0xff]  ;;  %v2159_v56 = vld [vmem:[#allocation7] sm:$0xff]  ;;  %v2161_v57 = vld [vmem:[#allocation7 + $0x8] sm:$0xff] }
  0x47   :  { %1721 = vmatprep.subr.bf16.mxu0 %v1720_v15  ;;  %v2163_v58 = vld [vmem:[#allocation7 + $0x40] sm:$0xff]  ;;  %v1400_v59 = vcombine.high %v2159_v56, %v2161_v57  ;;  %v2167_v60 = vld [vmem:[#allocation7 + $0x48] sm:$0xff]  ;;  %v2175_v0 = vld [vmem:[#allocation7 + $0x10] sm:$0xff] }
  0x48   :  { %v1408_v62 = vcombine.high %v2163_v58, %v2167_v60  ;;  %v2177_v1 = vld [vmem:[#allocation7 + $0x18] sm:$0xff]  ;;  %v2181_v3 = vld [vmem:[#allocation7 + $0x50] sm:$0xff]  ;;  %v2191_v8 = vld [vmem:[#allocation7 + $0x20] sm:$0xff] }
  0x49   :  { %v2183_v4 = vld [vmem:[#allocation7 + $0x58] sm:$0xff]  ;;  %v2193_v9 = vld [vmem:[#allocation7 + $0x28] sm:$0xff]  ;;  %v2197_v11 = vld [vmem:[#allocation7 + $0x60] sm:$0xff] }
  0x4a   :  { %1723 = vmatpush3.bf16.msra.mxu0 %v1720_v15  ;;  %605 = vmatprep.mubr.bf16.mxu1 %v1408_v62  ;;  %v2199_v12 = vld [vmem:[#allocation7 + $0x68] sm:$0xff]  ;;  %v2207_v16 = vld [vmem:[#allocation7 + $0x30] sm:$0xff]  ;;  %v2209_v17 = vld [vmem:[#allocation7 + $0x38] sm:$0xff] }
  0x4b   :  { %1725 = vmatprep.subr.bf16.mxu0 %v1724_v18  ;;  %v2213_v19 = vld [vmem:[#allocation7 + $0x70] sm:$0xff]  ;;  %v2215_v20 = vld [vmem:[#allocation7 + $0x78] sm:$0xff] }
  0x4c   :  { %v2263_v62 = vld [vmem:[#allocation7 + $0xb0] sm:$0xff]  ;;  %v730_v23 = vunpack.c.l.bf16 %v2213_v19  ;;  %v2355_v22 = vld [vmem:[#allocation7 + $0xf8] sm:$0xff] }
  0x4e   :  { %1727 = vmatpush3.bf16.msra.mxu0 %v1724_v18 }
  0x4f   :  { %1729 = vmatprep.subr.bf16.mxu0 %v1728_v21 }
  0x52   :  { %1731 = vmatpush3.bf16.msra.mxu0 %v1728_v21 }
  0x53   :  { %1733 = vmatprep.subr.bf16.mxu0 %v1732_v24 }
  0x56   :  { %1735 = vmatpush3.bf16.msra.mxu0 %v1732_v24  ;;  %v2223_v24 = vld [vmem:[#allocation7 + $0x80] sm:$0xff] }
  0x57   :  { %v734_v7 = vunpack.c.l.bf16 %v2223_v24 }
  0x59   :  { %1657 = vmatmul.mubr.f32.vlgmr.msra.gmra.mrb[0].mxu0 %v61_v25  ;;  %v2225_v25 = vld [vmem:[#allocation7 + $0x88] sm:$0xff] }
  0x5a   :  { %1659 = vmatprep.mubr.f32.mxu0 %v62_v26  ;;  %v737_v13 = vunpack.c.h.bf16 %v2225_v25 }
  0x5d   :  { %1660 = vmatmul.mubr.f32.gmra.mrb[2].mxu0 %v63_v27 }
  0x5e   :  { %1662 = vmatprep.mubr.f32.mxu0 %v64_v28  ;;  %v2231_v28 = vld [vmem:[#allocation7 + $0x90] sm:$0xff] }
  0x5f   :  { %v739_v6 = vunpack.c.h.bf16 %v2231_v28 }
  0x61   :  { %1663 = vmatmul.mubr.f32.gmra.mrb[4].mxu0 %v65_v29  ;;  %v2233_v29 = vld [vmem:[#allocation7 + $0x98] sm:$0xff] }
  0x62   :  { %1665 = vmatprep.mubr.f32.mxu0 %v66_v30  ;;  %v733_v30 = vunpack.c.h.bf16 %v2215_v20  ;;  %v740_v2 = vunpack.c.l.bf16 %v2233_v29  ;;  %v741_v63 = vunpack.c.h.bf16 %v2233_v29 }
  0x65   :  { %1666 = vmatmul.mubr.f32.gmra.mrb[6].mxu0 %v67_v31 }
  0x66   :  { %1668 = vmatprep.mubr.f32.mxu0 %v68_v32  ;;  %v702_v32 = vunpack.c.l.bf16 %v2159_v56 }
  0x69   :  { %1669 = vmatmul.mubr.f32.gmra.mrb[8].mxu0 %v69_v33  ;;  %v703_v33 = vunpack.c.h.bf16 %v2159_v56 }
  0x6a   :  { %1671 = vmatprep.mubr.f32.mxu0 %v70_v34 }
  0x6b   :  { %v766_v34 = vadd.f32 %v703_v33, %v702_v32  ;;  %v2265_v32 = vld [vmem:[#allocation7 + $0xb8] sm:$0xff] }
  0x6d   :  { %1672 = vmatmul.mubr.f32.gmra.mrb[10].mxu0 %v71_v35  ;;  %v706_v35 = vunpack.c.l.bf16 %v2175_v0  ;;  %767 = vadd.xlane.f32.xlu0 %v766_v34 }
  0x6e   :  { %1674 = vmatprep.mubr.f32.mxu0 %v72_v36  ;;  %v707_v36 = vunpack.c.h.bf16 %v2175_v0 }
  0x71   :  { %1675 = vmatmul.mubr.f32.gmra.mrb[12].mxu0 %v73_v37  ;;  %v704_v37 = vunpack.c.l.bf16 %v2161_v57 }
  0x72   :  { %1677 = vmatprep.mubr.f32.mxu0 %v74_v38  ;;  %v705_v38 = vunpack.c.h.bf16 %v2161_v57 }
  0x75   :  { %1678 = vmatmul.mubr.f32.gmra.mrb[14].mxu0 %v75_v39  ;;  %v708_v39 = vunpack.c.l.bf16 %v2177_v1 }
  0x76   :  { %1680 = vmatprep.mubr.f32.mxu0 %v76_v40  ;;  %v709_v40 = vunpack.c.h.bf16 %v2177_v1 }
  0x79   :  { %1681 = vmatmul.mubr.f32.gmra.mrb[16].mxu0 %v77_v41  ;;  %v2247_v41 = vld [vmem:[#allocation7 + $0xa0] sm:$0xff] }
  0x7a   :  { %1683 = vmatprep.mubr.f32.mxu0 %v78_v42  ;;  %v2249_v42 = vld [vmem:[#allocation7 + $0xa8] sm:$0xff] }
  0x7d   :  { %1684 = vmatmul.mubr.f32.gmra.mrb[18].mxu0 %v79_v43  ;;  %v772_v43 = vadd.f32 %v707_v36, %v706_v35  ;;  %v726_v35 = vunpack.c.l.bf16 %v2197_v11 }
  0x7e   :  { %1686 = vmatprep.mubr.f32.mxu0 %v80_v44 }
  0x7f   :  { %773 = vadd.xlane.f32.xlu1 %v772_v43  ;;  %v720_v43 = vunpack.c.l.bf16 %v2167_v60 }
  0x81   :  { %1687 = vmatmul.mubr.f32.gmra.mrb[20].mxu0 %v81_v45  ;;  %v2327_v45 = vld [vmem:[#allocation7 + $0xe8] sm:$0xff] }
  0x82   :  { %1689 = vmatprep.mubr.f32.mxu0 %v82_v46  ;;  %v769_v46 = vadd.f32 %v705_v38, %v704_v37  ;;  %v718_v38 = vunpack.c.l.bf16 %v2163_v58 }
  0x84   :  { %770 = vadd.xlane.f32.xlu0 %v769_v46  ;;  %v721_v46 = vunpack.c.h.bf16 %v2167_v60 }
  0x85   :  { %1690 = vmatmul.mubr.f32.gmra.mrb[22].mxu0 %v83_v47  ;;  %v775_v47 = vadd.f32 %v709_v40, %v708_v39  ;;  %v719_v39 = vunpack.c.h.bf16 %v2163_v58 }
  0x86   :  { %1692 = vmatprep.mubr.f32.mxu0 %v84_v48  ;;  %v710_v48 = vunpack.c.l.bf16 %v2191_v8 }
  0x87   :  { %776 = vadd.xlane.f32.xlu1 %v775_v47  ;;  %v790_v40 = vadd.f32 %v719_v39, %v718_v38  ;;  %v2275_v47 = vld [vmem:[#allocation7 + $0xc0] sm:$0xff]  ;;  %v2297_v39 = vld [vmem:[#allocation7 + $0xd0] sm:$0xff] }
  0x89   :  { %1693 = vmatmul.mubr.f32.gmra.mrb[24].mxu0 %v85_v49  ;;  %v711_v49 = vunpack.c.h.bf16 %v2191_v8 }
  0x8a   :  { %1695 = vmatprep.mubr.f32.mxu0 %v86_v50 }
  0x8b   :  { %v778_v50 = vadd.f32 %v711_v49, %v710_v48  ;;  %v2277_v48 = vld [vmem:[#allocation7 + $0xc8] sm:$0xff]  ;;  %v793_v49 = vadd.f32 %v721_v46, %v720_v43 }
  0x8d   :  { %1696 = vmatmul.mubr.f32.gmra.mrb[26].mxu0 %v87_v51  ;;  %v712_v51 = vunpack.c.l.bf16 %v2193_v9  ;;  %779 = vadd.xlane.f32.xlu0 %v778_v50 }
  0x8e   :  { %1698 = vmatprep.mubr.f32.mxu0 %v88_v52  ;;  %v713_v52 = vunpack.c.h.bf16 %v2193_v9 }
  0x90   :  { %v781_v33 = vadd.f32 %v713_v52, %v712_v51 }
  0x91   :  { %1699 = vmatmul.mubr.f32.gmra.mrb[28].mxu0 %v89_v53  ;;  %v714_v53 = vunpack.c.l.bf16 %v2207_v16 }
  0x92   :  { %1701 = vmatprep.mubr.f32.mxu0 %v90_v54  ;;  %v715_v54 = vunpack.c.h.bf16 %v2207_v16  ;;  %782 = vadd.xlane.f32.xlu1 %v781_v33 }
  0x94   :  { %v784_v36 = vadd.f32 %v715_v54, %v714_v53  ;;  %v722_v54 = vunpack.c.l.bf16 %v2181_v3 }
  0x95   :  { %1702 = vmatmul.mubr.f32.gmra.mrb[30].mxu0 %v91_v55  ;;  %v716_v55 = vunpack.c.l.bf16 %v2209_v17 }
  0x96   :  { %573 = vmatprep.mubr.bf16.mxu0 %v1400_v59  ;;  %v717_v59 = vunpack.c.h.bf16 %v2209_v17  ;;  %785 = vadd.xlane.f32.xlu0 %v784_v36  ;;  %v724_v36 = vunpack.c.l.bf16 %v2183_v4 }
  0x98   :  { %v787_v37 = vadd.f32 %v717_v59, %v716_v55  ;;  %v723_v55 = vunpack.c.h.bf16 %v2181_v3 }
  0x9a   :  { %788 = vadd.xlane.f32.xlu1 %v787_v37  ;;  %791 = vadd.xlane.f32.xlu0 %v790_v40  ;;  %v796_v33 = vadd.f32 %v723_v55, %v722_v54  ;;  %v725_v37 = vunpack.c.h.bf16 %v2183_v4  ;;  %v2299_v40 = vld [vmem:[#allocation7 + $0xd8] sm:$0xff]  ;;  %v728_v54 = vunpack.c.l.bf16 %v2199_v12 }
  0x9c   :  { %v799_v46 = vadd.f32 %v725_v37, %v724_v36 }
  0x9e   :  { %794 = vadd.xlane.f32.xlu1 %v793_v49  ;;  %797 = vadd.xlane.f32.xlu0 %v796_v33  ;;  %v727_v33 = vunpack.c.h.bf16 %v2197_v11  ;;  %v729_v49 = vunpack.c.h.bf16 %v2199_v12 }
  0xa0   :  { %v802_v37 = vadd.f32 %v727_v33, %v726_v35  ;;  %v805_v31 = vadd.f32 %v729_v49, %v728_v54  ;;  %v732_v35 = vunpack.c.l.bf16 %v2215_v20 }
  0xa2   :  { %800 = vadd.xlane.f32.xlu1 %v799_v46  ;;  %v2325_v46 = vld [vmem:[#allocation7 + $0xe0] sm:$0xff]  ;;  %803 = vadd.xlane.f32.xlu0 %v802_v37  ;;  %v731_v37 = vunpack.c.h.bf16 %v2213_v19  ;;  %v811_v15 = vadd.f32 %v733_v30, %v732_v35 }
  0xa4   :  { %v808_v54 = vadd.f32 %v731_v37, %v730_v23  ;;  %v736_v23 = vunpack.c.l.bf16 %v2225_v25 }
  0xa6   :  { %806 = vadd.xlane.f32.xlu1 %v805_v31  ;;  %v2353_v31 = vld [vmem:[#allocation7 + $0xf0] sm:$0xff]  ;;  %809 = vadd.xlane.f32.xlu0 %v808_v54  ;;  %v735_v54 = vunpack.c.h.bf16 %v2223_v24 }
  0xa8   :  { %v814_v35 = vadd.f32 %v735_v54, %v734_v7 }
  0xaa   :  { %812 = vadd.xlane.f32.xlu1 %v811_v15  ;;  %v738_v15 = vunpack.c.l.bf16 %v2231_v28  ;;  %815 = vadd.xlane.f32.xlu0 %v814_v35  ;;  %v747_v35 = vunpack.c.h.bf16 %v2263_v62 }
  0xac   :  { %v820_v54 = vadd.f32 %v739_v6, %v738_v15  ;;  %v746_v6 = vunpack.c.l.bf16 %v2263_v62 }
  0xae   :  { %821 = vadd.xlane.f32.xlu0 %v820_v54  ;;  %v752_v54 = vunpack.c.l.bf16 %v2277_v48 }
 0x12c   :  { %v2283_v52 = vpop.f32.mrb[0].mxu0 }
 0x12d   :  { %v2285_v53 = vpop.f32.mrb[1].mxu0 }
 0x12e   :  { %v2291_v59 = vpack.c.bf16 %v2283_v52, %v2285_v53 }
 0x130   :  { %v2295_v38 = vpop.f32.mrb[2].mxu0 }
 0x131   :  { %v2301_v43 = vpop.f32.mrb[3].mxu0 }
 0x132   :  { %v2309_v55 = vpack.c.bf16 %v2295_v38, %v2301_v43 }
 0x134   :  { %v2311_v51 = vpop.f32.mrb[4].mxu0 }
 0x135   :  { %v2313_v50 = vpop.f32.mrb[5].mxu0 }
 0x136   :  { %v2319_v36 = vpack.c.bf16 %v2311_v51, %v2313_v50 }
 0x138   :  { %v2323_v34 = vpop.f32.mrb[6].mxu0 }
 0x139   :  { %3050 = vst [vmem:[#allocation12_spill] sm:$0xff] %v2323_v34  ;;  %v2329_v44 = vpop.f32.mrb[7].mxu0 }
 0x13a   :  { %3051 = vst [vmem:[#allocation13_spill] sm:$0xff] %v2329_v44  ;;  %v2337_v33 = vpack.c.bf16 %v2323_v34, %v2329_v44 }
 0x13c   :  { %v2339_v27 = vpop.f32.mrb[8].mxu0 }
 0x13d   :  { %3052 = vst [vmem:[#allocation14_spill] sm:$0xff] %v2339_v27  ;;  %v2341_v26 = vpop.f32.mrb[9].mxu0 }
 0x13e   :  { %3053 = vst [vmem:[#allocation15_spill] sm:$0xff] %v2341_v26  ;;  %v2347_v49 = vpack.c.bf16 %v2339_v27, %v2341_v26  ;;  %v744_v26 = vunpack.c.l.bf16 %v2249_v42  ;;  %v745_v27 = vunpack.c.h.bf16 %v2249_v42 }
 0x140   :  { %v2351_v21 = vpop.f32.mrb[10].mxu0 }
 0x141   :  { %3054 = vst [vmem:[#allocation16_spill] sm:$0xff] %v2351_v21  ;;  %v2357_v18 = vpop.f32.mrb[11].mxu0 }
 0x142   :  { %3055 = vst [vmem:[#allocation17_spill] sm:$0xff] %v2357_v18  ;;  %v2365_v37 = vpack.c.bf16 %v2351_v21, %v2357_v18  ;;  %v743_v18 = vunpack.c.h.bf16 %v2247_v41  ;;  %v823_v21 = vadd.f32 %v741_v63, %v740_v2  ;;  %v748_v63 = vunpack.c.l.bf16 %v2265_v32 }
 0x143   :  { %v749_v2 = vunpack.c.h.bf16 %v2265_v32 }
 0x144   :  { %v2367_v14 = vpop.f32.mrb[12].mxu0 }
 0x145   :  { %3056 = vst [vmem:[#allocation18_spill] sm:$0xff] %v2367_v14  ;;  %v2369_v10 = vpop.f32.mrb[13].mxu0 }
 0x146   :  { %3057 = vst [vmem:[#allocation19_spill] sm:$0xff] %v2369_v10  ;;  %v2375_v30 = vpack.c.bf16 %v2367_v14, %v2369_v10  ;;  %v817_v10 = vadd.f32 %v737_v13, %v736_v23  ;;  %v742_v14 = vunpack.c.l.bf16 %v2247_v41 }
 0x148   :  { %v2379_v5 = vpop.f32.mrb[14].mxu0  ;;  %818 = vadd.xlane.f32.xlu1 %v817_v10  ;;  %v826_v23 = vadd.f32 %v743_v18, %v742_v14  ;;  %v829_v10 = vadd.f32 %v745_v27, %v744_v26  ;;  %v832_v18 = vadd.f32 %v747_v35, %v746_v6  ;;  %v751_v26 = vunpack.c.h.bf16 %v2275_v47 }
 0x149   :  { %v2385_v61 = vpop.f32.mrb[15].mxu0  ;;  %v835_v27 = vadd.f32 %v749_v2, %v748_v63  ;;  %v754_v35 = vunpack.c.l.bf16 %v2297_v39  ;;  %v756_v2 = vunpack.c.l.bf16 %v2299_v40 }
 0x14a   :  { %3058 = vst [vmem:[#allocation20_spill] sm:$0xff] %v2385_v61  ;;  %v2389_v7 = vpack.c.bf16 %v2379_v5, %v2385_v61  ;;  %827 = vadd.xlane.f32.xlu0 %v826_v23 }
 0x14c   :  { %v2395_v44 = vpop.f32.mrb[16].mxu0  ;;  %824 = vadd.xlane.f32.xlu1 %v823_v21  ;;  %v750_v21 = vunpack.c.l.bf16 %v2275_v47 }
 0x14d   :  { %v2397_v34 = vpop.f32.mrb[17].mxu0 }
 0x14e   :  { %3059 = vst [vmem:[#allocation21_spill] sm:$0xff] %v2397_v34  ;;  %v373_v13 = vpack.c.bf16 %v2395_v44, %v2397_v34  ;;  %833 = vadd.xlane.f32.xlu0 %v832_v18  ;;  %v838_v6 = vadd.f32 %v751_v26, %v750_v21  ;;  %v758_v26 = vunpack.c.l.bf16 %v2325_v46 }
 0x150   :  { %v2405_v15 = vpop.f32.mrb[18].mxu0  ;;  %1512 = vmatprep.subr.bf16.mxu0 %v373_v13  ;;  %1736 = vmatprep.subr.bf16.mxu1 %v373_v13  ;;  %v753_v13 = vunpack.c.h.bf16 %v2277_v48 }
 0x151   :  { %v2407_v61 = vpop.f32.mrb[19].mxu0  ;;  %1513 = vmatpush3.bf16.msra.mxu0 %v2291_v59  ;;  %1744 = vmatpush3.bf16.msra.mxu1 %v2291_v59 }
 0x152   :  { %3060 = vst [vmem:[#allocation22_spill] sm:$0xff] %v2407_v61  ;;  %v374_v14 = vpack.c.bf16 %v2405_v15, %v2407_v61  ;;  %830 = vadd.xlane.f32.xlu1 %v829_v10  ;;  %v755_v10 = vunpack.c.h.bf16 %v2297_v39  ;;  %v841_v63 = vadd.f32 %v753_v13, %v752_v54  ;;  %839 = vadd.xlane.f32.xlu0 %v838_v6  ;;  %v760_v13 = vunpack.c.l.bf16 %v2327_v45 }
 0x154   :  { %v2417_v34 = vpop.f32.mrb[20].mxu0  ;;  %1514 = vmatprep.subr.bf16.mxu0 %v374_v14  ;;  %1737 = vmatprep.subr.bf16.mxu1 %v374_v14  ;;  %v757_v14 = vunpack.c.h.bf16 %v2299_v40  ;;  %v844_v21 = vadd.f32 %v755_v10, %v754_v35  ;;  %v762_v10 = vunpack.c.l.bf16 %v2353_v31 }
 0x155   :  { %3061 = vst [vmem:[#allocation23_spill] sm:$0xff] %v2417_v34  ;;  %v2419_v59 = vpop.f32.mrb[21].mxu0  ;;  %1515 = vmatpush3.bf16.msra.mxu0 %v2309_v55  ;;  %1745 = vmatpush3.bf16.msra.mxu1 %v2309_v55 }
 0x156   :  { %3062 = vst [vmem:[#allocation24_spill] sm:$0xff] %v2419_v59  ;;  %v375_v23 = vpack.c.bf16 %v2417_v34, %v2419_v59  ;;  %836 = vadd.xlane.f32.xlu1 %v835_v27  ;;  %v759_v27 = vunpack.c.h.bf16 %v2325_v46  ;;  %v847_v54 = vadd.f32 %v757_v14, %v756_v2  ;;  %845 = vadd.xlane.f32.xlu0 %v844_v21  ;;  %v764_v14 = vunpack.c.l.bf16 %v2355_v22 }
 0x158   :  { %v2429_v61 = vpop.f32.mrb[22].mxu0  ;;  %1516 = vmatprep.subr.bf16.mxu0 %v375_v23  ;;  %1738 = vmatprep.subr.bf16.mxu1 %v375_v23  ;;  %v761_v23 = vunpack.c.h.bf16 %v2327_v45  ;;  %v850_v35 = vadd.f32 %v759_v27, %v758_v26 }
 0x159   :  { %3063 = vst [vmem:[#allocation25_spill] sm:$0xff] %v2429_v61  ;;  %v2431_v55 = vpop.f32.mrb[23].mxu0  ;;  %1517 = vmatpush3.bf16.msra.mxu0 %v2319_v36  ;;  %1746 = vmatpush3.bf16.msra.mxu1 %v2319_v36 }
 0x15a   :  { %3064 = vst [vmem:[#allocation26_spill] sm:$0xff] %v2431_v55  ;;  %v376_v18 = vpack.c.bf16 %v2429_v61, %v2431_v55  ;;  %842 = vadd.xlane.f32.xlu1 %v841_v63  ;;  %v763_v63 = vunpack.c.h.bf16 %v2353_v31  ;;  %v853_v2 = vadd.f32 %v761_v23, %v760_v13  ;;  %851 = vadd.xlane.f32.xlu0 %v850_v35 }
 0x15c   :  { %v2441_v34 = vpop.f32.mrb[24].mxu0  ;;  %1518 = vmatprep.subr.bf16.mxu0 %v376_v18  ;;  %1739 = vmatprep.subr.bf16.mxu1 %v376_v18  ;;  %v765_v18 = vunpack.c.h.bf16 %v2355_v22  ;;  %v856_v26 = vadd.f32 %v763_v63, %v762_v10  ;;  %v3074_v10 = vcombine.low %v2163_v58, %v2167_v60  ;;  %v3076_v63 = vcombine.high %v2181_v3, %v2183_v4 }
 0x15d   :  { %3065 = vst [vmem:[#allocation27_spill] sm:$0xff] %v2441_v34  ;;  %v2443_v36 = vpop.f32.mrb[25].mxu0  ;;  %1519 = vmatpush3.bf16.msra.mxu0 %v2337_v33  ;;  %1747 = vmatpush3.bf16.msra.mxu1 %v2337_v33  ;;  %v3080_v58 = vcombine.high %v2197_v11, %v2199_v12  ;;  %v3081_v60 = vcombine.low %v2191_v8, %v2193_v9 }
 0x15e   :  { %3066 = vst [vmem:[#allocation28_spill] sm:$0xff] %v2443_v36  ;;  %v377_v6 = vpack.c.bf16 %v2441_v34, %v2443_v36  ;;  %848 = vadd.xlane.f32.xlu1 %v847_v54  ;;  %v859_v27 = vadd.f32 %v765_v18, %v764_v14  ;;  %857 = vadd.xlane.f32.xlu0 %v856_v26 }
 0x160   :  { %v2453_v61 = vpop.f32.mrb[26].mxu0  ;;  %1520 = vmatprep.subr.bf16.mxu0 %v377_v6  ;;  %1740 = vmatprep.subr.bf16.mxu1 %v377_v6 }
 0x161   :  { %3067 = vst [vmem:[#allocation29_spill] sm:$0xff] %v2453_v61  ;;  %v2455_v33 = vpop.f32.mrb[27].mxu0  ;;  %1521 = vmatpush3.bf16.msra.mxu0 %v2347_v49  ;;  %1748 = vmatpush3.bf16.msra.mxu1 %v2347_v49 }
 0x162   :  { %3068 = vst [vmem:[#allocation30_spill] sm:$0xff] %v2455_v33  ;;  %v378_v21 = vpack.c.bf16 %v2453_v61, %v2455_v33  ;;  %854 = vadd.xlane.f32.xlu1 %v853_v2  ;;  %v3077_v2 = vcombine.low %v2175_v0, %v2177_v1 }
 0x164   :  { %v2461_v54 = vpop.f32.mrb[28].mxu0  ;;  %1522 = vmatprep.subr.bf16.mxu0 %v378_v21  ;;  %1741 = vmatprep.subr.bf16.mxu1 %v378_v21 }
 0x165   :  { %3069 = vst [vmem:[#allocation31_spill] sm:$0xff] %v2461_v54  ;;  %v2463_v13 = vpop.f32.mrb[29].mxu0  ;;  %1523 = vmatpush3.bf16.msra.mxu0 %v2365_v37  ;;  %1749 = vmatpush3.bf16.msra.mxu1 %v2365_v37  ;;  %v3073_v37 = vcombine.low %v2159_v56, %v2161_v57  ;;  %v3078_v56 = vcombine.low %v2181_v3, %v2183_v4 }
 0x166   :  { %3070 = vst [vmem:[#allocation32_spill] sm:$0xff] %v2463_v13  ;;  %v379_v49 = vpack.c.bf16 %v2461_v54, %v2463_v13  ;;  %860 = vadd.xlane.f32.xlu1 %v859_v27  ;;  %v3079_v57 = vcombine.high %v2191_v8, %v2193_v9  ;;  %v3084_v3 = vcombine.high %v2213_v19, %v2215_v20 }
 0x167   :  { %v3085_v4 = vcombine.low %v2207_v16, %v2209_v17  ;;  %v3086_v8 = vcombine.low %v2213_v19, %v2215_v20  ;;  %v3087_v9 = vcombine.high %v2223_v24, %v2225_v25  ;;  %v3092_v19 = vcombine.low %v2247_v41, %v2249_v42 }
 0x168   :  { %v2469_v23 = vpop.f32.mrb[30].mxu0  ;;  %1524 = vmatprep.subr.bf16.mxu0 %v379_v49  ;;  %1742 = vmatprep.subr.bf16.mxu1 %v379_v49  ;;  %v3093_v20 = vcombine.high %v2263_v62, %v2265_v32 }
 0x169   :  { %3071 = vst [vmem:[#allocation33_spill] sm:$0xff] %v2469_v23  ;;  %v2471_v6 = vpop.f32.mrb[31].mxu0  ;;  %1525 = vmatpush3.bf16.msra.mxu0 %v2375_v30  ;;  %1750 = vmatpush3.bf16.msra.mxu1 %v2375_v30  ;;  %v3075_v30 = vcombine.high %v2175_v0, %v2177_v1  ;;  %v3082_v0 = vcombine.low %v2197_v11, %v2199_v12 }
 0x16a   :  { %3072 = vst [vmem:[#allocation34_spill] sm:$0xff] %v2471_v6  ;;  %v380_v35 = vpack.c.bf16 %v2469_v23, %v2471_v6  ;;  %v3083_v1 = vcombine.high %v2207_v16, %v2209_v17  ;;  %v3088_v11 = vcombine.low %v2223_v24, %v2225_v25  ;;  %v3089_v12 = vcombine.high %v2231_v28, %v2233_v29 }
 0x16b   :  { %v3090_v16 = vcombine.low %v2231_v28, %v2233_v29  ;;  %v3091_v17 = vcombine.high %v2247_v41, %v2249_v42  ;;  %v3094_v24 = vcombine.low %v2263_v62, %v2265_v32  ;;  %v3095_v25 = vcombine.high %v2275_v47, %v2277_v48 }
 0x16c   :  { %1526 = vmatprep.subr.bf16.mxu0 %v380_v35  ;;  %1743 = vmatprep.subr.bf16.mxu1 %v380_v35  ;;  %v3096_v28 = vcombine.low %v2275_v47, %v2277_v48  ;;  %v3097_v29 = vcombine.high %v2297_v39, %v2299_v40  ;;  %v3098_v41 = vcombine.low %v2297_v39, %v2299_v40  ;;  %v2569_v48 = vpop.xlane.xlu0 %767  ;;  %v2571_v39 = vpop.xlane.xlu1 %773 }
 0x16d   :  { %1527 = vmatpush3.bf16.msra.mxu0 %v2389_v7  ;;  %1751 = vmatpush3.bf16.msra.mxu1 %v2389_v7  ;;  %v3099_v42 = vcombine.high %v2325_v46, %v2327_v45  ;;  %v3100_v62 = vcombine.low %v2325_v46, %v2327_v45  ;;  %v3101_v32 = vcombine.high %v2353_v31, %v2355_v22  ;;  %vm862_vm0 = vcmp.gt.f32.partialorder %v2569_v48, 0.0 }
 0x16e   :  { %v3102_v47 = vcombine.low %v2353_v31, %v2355_v22  ;;  %vm864_vm1 = vcmp.gt.f32.partialorder %v2571_v39, 0.0  ;;  %v894_v31 = vsel %vm862_vm0, %v2569_v48, 1.0 }
 0x16f   :  { %v896_v26 = vsel %vm864_vm1, %v2571_v39, 1.0  ;;  %1790 = vrcp.f32 %v894_v31  ;;  %v3104_v31 = vld [vmem:[#allocation13_spill] sm:$0xff] }
 0x170   :  { %574 = vmatmul.mubr.bf16.vlgmr.msra.gmra.mrb[32].mxu0 %v3073_v37  ;;  %606 = vmatmul.mubr.bf16.vlgmr.msra.gmra.mrb[0].mxu1 %v3074_v10  ;;  %v2573_v40 = vpop.xlane.xlu0 %770  ;;  %v2575_v7 = vpop.xlane.xlu1 %776  ;;  %1792 = vrcp.f32 %v896_v26  ;;  %v3105_v26 = vld [vmem:[#allocation14_spill] sm:$0xff] }
 0x171   :  { %581 = vmatprep.mubr.bf16.mxu0 %v3075_v30  ;;  %613 = vmatprep.mubr.bf16.mxu1 %v3076_v63  ;;  %vm863_vm2 = vcmp.gt.f32.partialorder %v2573_v40, 0.0  ;;  %vm865_vm3 = vcmp.gt.f32.partialorder %v2575_v7, 0.0 }
 0x172   :  { %v895_v27 = vsel %vm863_vm2, %v2573_v40, 1.0  ;;  %v897_v35 = vsel %vm865_vm3, %v2575_v7, 1.0 }
 0x173   :  { %1794 = vrcp.f32 %v895_v27  ;;  %v3106_v27 = vld [vmem:[#allocation15_spill] sm:$0xff] }
 0x174   :  { %v2577_v14 = vpop.xlane.xlu0 %779  ;;  %v2579_v45 = vpop.xlane.xlu1 %782  ;;  %1796 = vrcp.f32 %v897_v35  ;;  %v2696_v35 = vmul.f32 0.8, %v3106_v27 }
 0x175   :  { %vm866_vm4 = vcmp.gt.f32.partialorder %v2577_v14, 0.0  ;;  %vm867_vm5 = vcmp.gt.f32.partialorder %v2579_v45, 0.0 }
 0x176   :  { %v898_v37 = vsel %vm866_vm4, %v2577_v14, 1.0  ;;  %v899_v30 = vsel %vm867_vm5, %v2579_v45, 1.0 }
 0x177   :  { %1798 = vrcp.f32 %v898_v37  ;;  %v3107_v37 = vld [vmem:[#allocation16_spill] sm:$0xff] }
 0x178   :  { %582 = vmatmul.mubr.bf16.gmra.mrb[36].mxu0 %v3077_v2  ;;  %614 = vmatmul.mubr.bf16.gmra.mrb[4].mxu1 %v3078_v56  ;;  %v2581_v46 = vpop.xlane.xlu0 %785  ;;  %v2583_v18 = vpop.xlane.xlu1 %788  ;;  %1800 = vrcp.f32 %v899_v30  ;;  %v2699_v30 = vmul.f32 0.8, %v3107_v37 }
 0x179   :  { %589 = vmatprep.mubr.bf16.mxu0 %v3079_v57  ;;  %621 = vmatprep.mubr.bf16.mxu1 %v3080_v58  ;;  %vm868_vm6 = vcmp.gt.f32.partialorder %v2581_v46, 0.0  ;;  %vm869_vm7 = vcmp.gt.f32.partialorder %v2583_v18, 0.0 }
 0x17a   :  { %v900_v63 = vsel %vm868_vm6, %v2581_v46, 1.0  ;;  %v901_v56 = vsel %vm869_vm7, %v2583_v18, 1.0 }
 0x17b   :  { %1802 = vrcp.f32 %v900_v63  ;;  %v3108_v63 = vld [vmem:[#allocation17_spill] sm:$0xff] }
 0x17c   :  { %v2587_v22 = vpop.xlane.xlu0 %791  ;;  %v2594_v21 = vpop.xlane.xlu1 %794  ;;  %1804 = vrcp.f32 %v901_v56  ;;  %v2702_v56 = vmul.f32 0.8, %v3108_v63 }
 0x17d   :  { %vm870_vm8 = vcmp.gt.f32.partialorder %v2587_v22, 0.0  ;;  %vm871_vm9 = vcmp.gt.f32.partialorder %v2594_v21, 0.0 }
 0x17e   :  { %v902_v57 = vsel %vm870_vm8, %v2587_v22, 1.0 }
 0x17f   :  { %1806 = vrcp.f32 %v902_v57 }
 0x180   :  { %590 = vmatmul.mubr.bf16.gmra.mrb[40].mxu0 %v3081_v60  ;;  %622 = vmatmul.mubr.bf16.gmra.mrb[8].mxu1 %v3082_v0  ;;  %v2604_v49 = vpop.xlane.xlu0 %797  ;;  %v2614_v10 = vpop.xlane.xlu1 %800  ;;  %v903_v0 = vsel %vm871_vm9, %v2594_v21, 1.0 }
 0x181   :  { %597 = vmatprep.mubr.bf16.mxu0 %v3083_v1  ;;  %629 = vmatprep.mubr.bf16.mxu1 %v3084_v3  ;;  %vm872_vm10 = vcmp.gt.f32.partialorder %v2604_v49, 0.0  ;;  %vm873_vm11 = vcmp.gt.f32.partialorder %v2614_v10, 0.0  ;;  %1808 = vrcp.f32 %v903_v0  ;;  %v3109_v0 = vld [vmem:[#allocation18_spill] sm:$0xff] }
 0x182   :  { %v904_v1 = vsel %vm872_vm10, %v2604_v49, 1.0 }
 0x183   :  { %1810 = vrcp.f32 %v904_v1  ;;  %v2705_v1 = vmul.f32 0.8, %v3109_v0 }
 0x184   :  { %v2623_v2 = vpop.xlane.xlu0 %803  ;;  %v2632_v58 = vpop.xlane.xlu1 %806 }
 0x185   :  { %vm874_vm12 = vcmp.gt.f32.partialorder %v2623_v2, 0.0  ;;  %vm875_vm13 = vcmp.gt.f32.partialorder %v2632_v58, 0.0 }
 0x188   :  { %598 = vmatmul.mubr.bf16.gmra.mrb[44].mxu0 %v3085_v4  ;;  %630 = vmatmul.mubr.bf16.gmra.mrb[12].mxu1 %v3086_v8  ;;  %v2636_v60 = vpop.xlane.xlu0 %809  ;;  %v2646_v3 = vpop.xlane.xlu1 %812  ;;  %v905_v8 = vsel %vm873_vm11, %v2614_v10, 1.0 }
 0x189   :  { %637 = vmatprep.mubr.bf16.mxu1 %v3087_v9  ;;  %v1791_v4 = vpop.eup %1790  ;;  %vm3038_vm14 = vcmp.gt.f32.partialorder %v2636_v60, 0.0  ;;  %vm877_vm15 = vcmp.gt.f32.partialorder %v2646_v3, 0.0  ;;  %1812 = vrcp.f32 %v905_v8  ;;  %v3110_v8 = vld [vmem:[#allocation19_spill] sm:$0xff] }
 0x18a   :  { %v1793_v9 = vpop.eup %1792 }
 0x190   :  { %638 = vmatmul.mubr.bf16.gmra.mrb[16].mxu1 %v3088_v11  ;;  %v906_v11 = vsel %vm874_vm12, %v2623_v2, 1.0 }
 0x191   :  { %645 = vmatprep.mubr.bf16.mxu1 %v3089_v12  ;;  %v1795_v12 = vpop.eup %1794  ;;  %1814 = vrcp.f32 %v906_v11  ;;  %v2708_v11 = vmul.f32 0.8, %v3110_v8 }
 0x198   :  { %646 = vmatmul.mubr.bf16.gmra.mrb[20].mxu1 %v3090_v16  ;;  %v907_v16 = vsel %vm875_vm13, %v2632_v58, 1.0 }
 0x199   :  { %653 = vmatprep.mubr.bf16.mxu1 %v3091_v17  ;;  %v1797_v17 = vpop.eup %1796  ;;  %1816 = vrcp.f32 %v907_v16  ;;  %v927_v16 = vmul.f32 0.2, %v1791_v4  ;;  %v2718_v4 = vmul.f32 0.8, %v2379_v5 }
 0x1a0   :  { %654 = vmatmul.mubr.bf16.gmra.mrb[24].mxu1 %v3092_v19  ;;  %v2660_v19 = vmul.f32 0.8, %v2283_v52  ;;  %v2677_v52 = vmul.f32 0.8, %v2311_v51  ;;  %v2692_v51 = vmul.f32 0.8, %v3105_v26 }
 0x1a1   :  { %661 = vmatprep.mubr.bf16.mxu1 %v3093_v20  ;;  %v2663_v20 = vmul.f32 0.8, %v2285_v53  ;;  %v933_v26 = vmul.f32 0.2, %v1797_v17 }
 0x1a8   :  { %662 = vmatmul.mubr.bf16.gmra.mrb[28].mxu1 %v3094_v24  ;;  %v908_v24 = vsel %vm3038_vm14, %v2636_v60, 1.0 }
 0x1a9   :  { %669 = vmatprep.mubr.bf16.mxu1 %v3095_v25  ;;  %v2668_v25 = vpop.xlane.xlu0 %815  ;;  %1818 = vrcp.f32 %v908_v24  ;;  %v931_v24 = vmul.f32 0.2, %v1793_v9  ;;  %v3111_v9 = vld [vmem:[#allocation20_spill] sm:$0xff] }
 0x1aa   :  { %vm3043_vm14 = vcmp.gt.f32.partialorder %v2668_v25, 0.0 }
 0x1ad   :  { %v2715_v13 = vpop.xlane.xlu0 %821 }
 0x1b0   :  { %670 = vmatmul.mubr.bf16.gmra.mrb[32].mxu1 %v3096_v28  ;;  %v1799_v28 = vpop.eup %1798 }
 0x1b1   :  { %677 = vmatprep.mubr.bf16.mxu1 %v3097_v29  ;;  %v2671_v29 = vmul.f32 0.8, %v2295_v38  ;;  %v1801_v53 = vpop.eup %1800  ;;  %v909_v38 = vsel %vm877_vm15, %v2646_v3, 1.0  ;;  %v935_v27 = vmul.f32 0.2, %v1799_v28  ;;  %v3112_v28 = vld [vmem:[#allocation21_spill] sm:$0xff] }
 0x1b2   :  { %1820 = vrcp.f32 %v909_v38  ;;  %v937_v37 = vmul.f32 0.2, %v1801_v53  ;;  %v2724_v38 = vmul.f32 0.8, %v2395_v44  ;;  %v2727_v53 = vmul.f32 0.8, %v3112_v28 }
 0x1b3   :  { %v2740_v44 = vsel %vm865_vm3, %v933_v26, 0.0 }
 0x1b4   :  { %v2748_v48 = vsel %vm867_vm5, %v937_v37, 0.0 }
 0x1b8   :  { %678 = vmatmul.mubr.bf16.gmra.mrb[36].mxu1 %v3098_v41  ;;  %v2674_v41 = vmul.f32 0.8, %v2301_v43  ;;  %v2689_v43 = vmul.f32 0.8, %v3104_v31  ;;  %v910_v31 = vsel %vm3043_vm14, %v2668_v25, 1.0 }
 0x1b9   :  { %685 = vmatprep.mubr.bf16.mxu1 %v3099_v42  ;;  %v2680_v42 = vmul.f32 0.8, %v2313_v50  ;;  %1822 = vrcp.f32 %v910_v31  ;;  %v2744_v31 = vsel %vm866_vm4, %v935_v27, 0.0 }
 0x1c0   :  { %686 = vmatmul.mubr.bf16.gmra.mrb[40].mxu1 %v3100_v62  ;;  %v3103_v62 = vld [vmem:[#allocation12_spill] sm:$0xff] }
 0x1c1   :  { %693 = vmatprep.mubr.bf16.mxu1 %v3101_v32  ;;  %v2683_v32 = vmul.f32 0.8, %v3103_v62  ;;  %v929_v62 = vmul.f32 0.2, %v1795_v12  ;;  %v2721_v12 = vmul.f32 0.8, %v3111_v9 }
 0x1c8   :  { %694 = vmatmul.mubr.bf16.gmra.mrb[44].mxu1 %v3102_v47  ;;  %v1803_v47 = vpop.eup %1802 }
 0x1c9   :  { %v1805_v50 = vpop.eup %1804  ;;  %v939_v6 = vmul.f32 0.2, %v1803_v47  ;;  %v990_v47 = vsel %vm862_vm0, %v927_v16, 0.0  ;;  %vm880_vm0 = vcmp.gt.f32.partialorder %v2715_v13, 0.0 }
 0x1ca   :  { %v1807_v57 = vpop.eup %1806  ;;  %v941_v0 = vmul.f32 0.2, %v1805_v50  ;;  %v2733_v50 = vsel %vm864_vm1, %v931_v24, 0.0 }
 0x1cb   :  { %v1809_v23 = vpop.eup %1808  ;;  %v943_v54 = vmul.f32 0.2, %v1807_v57  ;;  %v991_v57 = vsel %vm863_vm2, %v929_v62, 0.0  ;;  %v2752_v16 = vsel %vm868_vm6, %v939_v6, 0.0  ;;  %vm3113_vm2 = vcmp.gt.f32.partialorder %v2636_v60, 0.0 }
 0x1cc   :  { %v1811_v8 = vpop.eup %1810  ;;  %v2756_v40 = vsel %vm869_vm7, %v941_v0, 0.0  ;;  %v945_v24 = vmul.f32 0.2, %v1809_v23  ;;  %vm3114_vm6 = vcmp.gt.f32.partialorder %v2668_v25, 0.0 }
 0x1cd   :  { %v1813_v17 = vpop.eup %1812  ;;  %v998_v7 = vsel %vm870_vm8, %v943_v54, 0.0  ;;  %v947_v26 = vmul.f32 0.2, %v1811_v8 }
 0x1ce   :  { %v1815_v5 = vpop.eup %1814  ;;  %v949_v46 = vmul.f32 0.2, %v1813_v17  ;;  %v999_v8 = vsel %vm871_vm9, %v945_v24, 0.0  ;;  %v912_v17 = vsel %vm880_vm0, %v2715_v13, 1.0 }
 0x1cf   :  { %v1817_v39 = vpop.eup %1816  ;;  %v951_v22 = vmul.f32 0.2, %v1815_v5  ;;  %v1000_v21 = vsel %vm872_vm10, %v947_v26, 0.0 }
 0x1d0   :  { %v1819_v45 = vpop.eup %1818  ;;  %v953_v33 = vmul.f32 0.2, %v1817_v39  ;;  %v1001_v24 = vsel %vm873_vm11, %v949_v46, 0.0 }
 0x1d1   :  { %v1821_v54 = vpop.eup %1820  ;;  %v955_v55 = vmul.f32 0.2, %v1819_v45 }
 0x1d2   :  { %v957_v45 = vmul.f32 0.2, %v1821_v54 }
 0x1d5   :  { %v2713_v63 = vpop.xlane.xlu1 %818 }
 0x1d6   :  { %vm879_vm14 = vcmp.gt.f32.partialorder %v2713_v63, 0.0 }
 0x1d7   :  { %v2762_v62 = vpop.xlane.xlu0 %827  ;;  %v911_v6 = vsel %vm879_vm14, %v2713_v63, 1.0 }
 0x1d8   :  { %1824 = vrcp.f32 %v911_v6  ;;  %vm882_vm3 = vcmp.gt.f32.partialorder %v2762_v62, 0.0 }
 0x1d9   :  { %v2760_v14 = vpop.xlane.xlu1 %824  ;;  %1826 = vrcp.f32 %v912_v17 }
 0x1da   :  { %vm881_vm1 = vcmp.gt.f32.partialorder %v2760_v14, 0.0 }
 0x1db   :  { %v913_v6 = vsel %vm881_vm1, %v2760_v14, 1.0  ;;  %v2802_v10 = vpop.xlane.xlu0 %833 }
 0x1dc   :  { %1828 = vrcp.f32 %v913_v6  ;;  %vm884_vm5 = vcmp.gt.f32.partialorder %v2802_v10, 0.0 }
 0x1df   :  { %v2800_v49 = vpop.xlane.xlu1 %830 }
 0x1e0   :  { %vm883_vm4 = vcmp.gt.f32.partialorder %v2800_v49, 0.0 }
 0x243   :  { %v1528_v27 = vpop.f32.mrb[32].mxu0  ;;  %v1552_v37 = vpop.f32.mrb[0].mxu1 }
 0x244   :  { %v1529_v18 = vpop.f32.mrb[33].mxu0  ;;  %v1553_v0 = vpop.f32.mrb[1].mxu1 }
 0x245   :  { %v1530_v23 = vadd.f32 %v1529_v18, %v1528_v27  ;;  %v1554_v9 = vadd.f32 %v1553_v0, %v1552_v37  ;;  %v1531_v28 = vpop.f32.mrb[34].mxu0  ;;  %v1555_v61 = vpop.f32.mrb[2].mxu1  ;;  %v2777_v27 = vld [vmem:[%s3023_s3] ss:$0 sm:$0xff]  ;;  %s2081_s3 = smov [#allocation8]  }
 0x246   :  { %v1532_v34 = vpop.f32.mrb[35].mxu0  ;;  %v1556_v36 = vpop.f32.mrb[3].mxu1  ;;  %s1386_s26 = sshll.u32 %s2081_s3, 4  ;;  %s1387_s26 = int_to_ptr.vmem [resolvable:$true] %s1386_s26 }
 0x247   :  { %v1054_v5 = vmul.f32 %v1530_v23, %v990_v47  ;;  %v1062_v39 = vmul.f32 %v1554_v9, %v998_v7  ;;  %v1533_v37 = vadd.f32 %v1532_v34, %v1531_v28  ;;  %v1557_v18 = vadd.f32 %v1556_v36, %v1555_v61  ;;  %v1823_v47 = vpop.eup %1822  ;;  %s2048_s29 = scalar_lea.vmem %s1387_s26, 4096  ;;  %p2053_p11 = scmp.lt.s32.totalorder %s1387_s26, %s1387_s26 }
 0x248   :  { %v2790_v61 = vsel %vm874_vm12, %v951_v22, 0.0  ;;  %v2794_v34 = vsel %vm875_vm13, %v953_v33, 0.0  ;;  %v2798_v36 = vsel %vm3113_vm2, %v955_v55, 0.0  ;;  %v2810_v55 = vsel %vm877_vm15, %v957_v45, 0.0  ;;  %p2049_p10 = scmp.ne.s32.totalorder %s1387_s26, %s2048_s29  ;;  %p2054_p12 = scmp.lt.s32.totalorder %s2048_s29, %s2048_s29 }
 0x249   :  { %v1086_v0 = vadd.f32 %v1054_v5, %v2663_v20  ;;  %v1094_v23 = vadd.f32 %v1062_v39, %v2696_v35  ;;  %v1055_v59 = vmul.f32 %v1533_v37, %v991_v57  ;;  %v1063_v7 = vmul.f32 %v1557_v18, %v999_v8  ;;  %v1825_v18 = vpop.eup %1824 }
 0x24a   :  { %v959_v60 = vmul.f32 0.2, %v1823_v47  ;;  %p2055_p13 = por %p2054_p12, %p2053_p11 }
 0x24b   :  { %v1125_v20 = vadd.f32 %v2777_v27, %v1086_v0  ;;  %v1133_v35 = vadd.f32 %v2777_v27, %v1094_v23  ;;  %v1087_v2 = vadd.f32 %v1055_v59, %v2660_v19  ;;  %v1095_v57 = vadd.f32 %v1063_v7, %v2692_v51  ;;  %v1534_v58 = vpop.f32.mrb[36].mxu0  ;;  %v1558_v33 = vpop.f32.mrb[4].mxu1 }
 0x24c   :  { %v1535_v26 = vpop.f32.mrb[37].mxu0  ;;  %v1559_v46 = vpop.f32.mrb[5].mxu1  ;;  %v914_v23 = vsel %vm882_vm3, %v2762_v62, 1.0  ;;  %v915_v7 = vsel %vm883_vm4, %v2800_v49, 1.0  ;;  %p2056_p0 = pnand %p2055_p13, %p2049_p10 }
 0x24d   :  { %v1432_v22 = vmul.f32 -1.442695, %v1125_v20  ;;  %v1440_v54 = vmul.f32 -1.442695, %v1133_v35  ;;  %v1126_v9 = vadd.f32 %v2777_v27, %v1087_v2  ;;  %v1134_v59 = vadd.f32 %v2777_v27, %v1095_v57  ;;  %v1537_v19 = vpop.f32.mrb[38].mxu0  ;;  %v1561_v51 = vpop.f32.mrb[6].mxu1 }
 0x24e   :  { %v1536_v28 = vadd.f32 %v1535_v26, %v1534_v58  ;;  %v1560_v8 = vadd.f32 %v1559_v46, %v1558_v33  ;;  %v1538_v17 = vpop.f32.mrb[39].mxu0  ;;  %v1562_v5 = vpop.f32.mrb[7].mxu1  ;;  %v961_v58 = vmul.f32 0.2, %v1825_v18  ;;  %v916_v33 = vsel %vm884_vm5, %v2802_v10, 1.0 }
 0x24f   :  { %1830 = vpow2.f32 %v1432_v22  ;;  %v1433_v3 = vmul.f32 -1.442695, %v1126_v9  ;;  %v1441_v39 = vmul.f32 -1.442695, %v1134_v59  ;;  %v1539_v37 = vadd.f32 %v1538_v17, %v1537_v19  ;;  %v2835_v26 = vpop.eup %1826 }
 0x250   :  { %1832 = vpow2.f32 %v1440_v54  ;;  %v1056_v45 = vmul.f32 %v1536_v28, %v2733_v50  ;;  %v1064_v6 = vmul.f32 %v1560_v8, %v1000_v21  ;;  %v1563_v47 = vadd.f32 %v1562_v5, %v1561_v51  ;;  %v2841_v59 = vpop.eup %1828 }
 0x251   :  { %1834 = vpow2.f32 %v1433_v3  ;;  %v1057_v0 = vmul.f32 %v1539_v37, %v2740_v44  ;;  %v2830_v44 = vsel %vm3114_vm6, %v959_v60, 0.0  ;;  %v2846_v37 = vpop.xlane.xlu1 %836 }
 0x252   :  { %1836 = vpow2.f32 %v1441_v39  ;;  %v1088_v20 = vadd.f32 %v1056_v45, %v2674_v41  ;;  %v1096_v35 = vadd.f32 %v1064_v6, %v2702_v56  ;;  %v1065_v2 = vmul.f32 %v1563_v47, %v1001_v24 }
 0x253   :  { %v1089_v50 = vadd.f32 %v1057_v0, %v2671_v29  ;;  %v1540_v21 = vpop.f32.mrb[40].mxu0  ;;  %v1564_v57 = vpop.f32.mrb[8].mxu1  ;;  %1838 = vrcp.f32 %v914_v23  ;;  %v2850_v6 = vsel %vm879_vm14, %v961_v58, 0.0  ;;  %vm885_vm7 = vcmp.gt.f32.partialorder %v2846_v37, 0.0 }
 0x254   :  { %v1127_v41 = vadd.f32 %v2777_v27, %v1088_v20  ;;  %v1135_v56 = vadd.f32 %v2777_v27, %v1096_v35  ;;  %v1097_v24 = vadd.f32 %v1065_v2, %v2699_v30  ;;  %v1541_v29 = vpop.f32.mrb[41].mxu0  ;;  %v1565_v46 = vpop.f32.mrb[9].mxu1  ;;  %1840 = vrcp.f32 %v915_v7 }
 0x255   :  { %v1128_v25 = vadd.f32 %v2777_v27, %v1089_v50  ;;  %v1542_v60 = vadd.f32 %v1541_v29, %v1540_v21  ;;  %v1566_v22 = vadd.f32 %v1565_v46, %v1564_v57  ;;  %v1543_v54 = vpop.f32.mrb[42].mxu0  ;;  %v1567_v9 = vpop.f32.mrb[10].mxu1  ;;  %1842 = vrcp.f32 %v916_v33 }
 0x256   :  { %v1434_v19 = vmul.f32 -1.442695, %v1127_v41  ;;  %v1442_v51 = vmul.f32 -1.442695, %v1135_v56  ;;  %v1136_v28 = vadd.f32 %v2777_v27, %v1097_v24  ;;  %v1544_v8 = vpop.f32.mrb[43].mxu0  ;;  %v1568_v17 = vpop.f32.mrb[11].mxu1 }
 0x257   :  { %v1435_v30 = vmul.f32 -1.442695, %v1128_v25  ;;  %v1058_v5 = vmul.f32 %v1542_v60, %v2744_v31  ;;  %v1066_v3 = vmul.f32 %v1566_v22, %v2790_v61  ;;  %v1545_v39 = vadd.f32 %v1544_v8, %v1543_v54 }
 0x258   :  { %1844 = vpow2.f32 %v1434_v19  ;;  %v1443_v18 = vmul.f32 -1.442695, %v1136_v28  ;;  %v1569_v45 = vadd.f32 %v1568_v17, %v1567_v9  ;;  %v917_v28 = vsel %vm885_vm7, %v2846_v37, 1.0 }
 0x259   :  { %v1831_v47 = vpop.eup %1830  ;;  %1846 = vpow2.f32 %v1442_v51  ;;  %v1090_v0 = vadd.f32 %v1058_v5, %v2680_v42  ;;  %v1098_v23 = vadd.f32 %v1066_v3, %v2708_v11  ;;  %v1059_v31 = vmul.f32 %v1545_v39, %v2748_v48 }
 0x25a   :  { %v1833_v7 = vpop.eup %1832  ;;  %v1253_v61 = vadd.f32 1.0, %v1831_v47  ;;  %1848 = vpow2.f32 %v1435_v30  ;;  %v1067_v20 = vmul.f32 %v1569_v45, %v2794_v34 }
 0x25b   :  { %v1835_v35 = vpop.eup %1834  ;;  %v1261_v2 = vadd.f32 1.0, %v1833_v7  ;;  %1850 = vpow2.f32 %v1443_v18  ;;  %v1129_v63 = vadd.f32 %v2777_v27, %v1090_v0  ;;  %v1137_v50 = vadd.f32 %v2777_v27, %v1098_v23  ;;  %v1546_v21 = vpop.f32.mrb[44].mxu0 }
 0x25c   :  { %v1570_v42 = vpop.f32.mrb[12].mxu1  ;;  %v1837_v57 = vpop.eup %1836  ;;  %1852 = vrcp.f32 %v1253_v61  ;;  %v1254_v11 = vadd.f32 1.0, %v1835_v35  ;;  %v1091_v48 = vadd.f32 %v1059_v31, %v2677_v52  ;;  %v1099_v58 = vadd.f32 %v1067_v20, %v2705_v1 }
 0x25d   :  { %v1547_v33 = vpop.f32.mrb[45].mxu0  ;;  %v1571_v34 = vpop.f32.mrb[13].mxu1  ;;  %1854 = vrcp.f32 %v1261_v2  ;;  %v1262_v41 = vadd.f32 1.0, %v1837_v57  ;;  %v1436_v56 = vmul.f32 -1.442695, %v1129_v63 }
 0x25e   :  { %v1444_v24 = vmul.f32 -1.442695, %v1137_v50  ;;  %v1549_v29 = vpop.f32.mrb[46].mxu0  ;;  %v2861_v46 = vpop.eup %1838  ;;  %1856 = vrcp.f32 %v1254_v11  ;;  %v1130_v25 = vadd.f32 %v2777_v27, %v1091_v48  ;;  %v1138_v60 = vadd.f32 %v2777_v27, %v1099_v58 }
 0x25f   :  { %v1548_v22 = vadd.f32 %v1547_v33, %v1546_v21  ;;  %v1573_v54 = vpop.f32.mrb[14].mxu1  ;;  %v1550_v9 = vpop.f32.mrb[47].mxu0  ;;  %1858 = vrcp.f32 %v1262_v41  ;;  %v1572_v1 = vadd.f32 %v1571_v34, %v1570_v42  ;;  %v963_v0 = vmul.f32 0.2, %v2835_v26 }
 0x260   :  { %v2865_v52 = vpop.eup %1840  ;;  %v1551_v19 = vadd.f32 %v1550_v9, %v1549_v29  ;;  %v1574_v51 = vpop.f32.mrb[15].mxu1  ;;  %1860 = vpow2.f32 %v1436_v56  ;;  %v1437_v17 = vmul.f32 -1.442695, %v1130_v25  ;;  %v1445_v30 = vmul.f32 -1.442695, %v1138_v60  ;;  %v3115_v25 = vld [vmem:[#allocation22_spill] sm:$0xff] }
 0x261   :  { %v2870_v8 = vpop.eup %1842  ;;  %v1060_v5 = vmul.f32 %v1548_v22, %v2752_v16  ;;  %1862 = vpow2.f32 %v1444_v24  ;;  %v1068_v3 = vmul.f32 %v1572_v1, %v2798_v36  ;;  %v1575_v18 = vadd.f32 %v1574_v51, %v1573_v54  ;;  %v2893_v54 = vpop.xlane.xlu0 %839 }
 0x262   :  { %v1061_v39 = vmul.f32 %v1551_v19, %v2756_v40  ;;  %v1845_v45 = vpop.eup %1844  ;;  %1864 = vpow2.f32 %v1437_v17  ;;  %v965_v23 = vmul.f32 0.2, %v2841_v59  ;;  %v2886_v41 = vmul.f32 0.8, %v2405_v15 }
 0x263   :  { %v1092_v47 = vadd.f32 %v1060_v5, %v2689_v43  ;;  %v1847_v31 = vpop.eup %1846  ;;  %v1255_v7 = vadd.f32 1.0, %v1845_v45  ;;  %1866 = vpow2.f32 %v1445_v30  ;;  %v1100_v61 = vadd.f32 %v1068_v3, %v2721_v12  ;;  %v1576_v20 = vpop.f32.mrb[16].mxu1 }
 0x264   :  { %v1093_v16 = vadd.f32 %v1061_v39, %v2683_v32  ;;  %v1849_v36 = vpop.eup %1848  ;;  %v1263_v35 = vadd.f32 1.0, %v1847_v31  ;;  %v1069_v2 = vmul.f32 %v1575_v18, %v2810_v55  ;;  %v1577_v63 = vpop.f32.mrb[17].mxu1  ;;  %1868 = vrcp.f32 %v917_v28 }
 0x265   :  { %v1131_v40 = vadd.f32 %v2777_v27, %v1092_v47  ;;  %v1851_v43 = vpop.eup %1850  ;;  %1870 = vrcp.f32 %v1255_v7  ;;  %v1256_v26 = vadd.f32 1.0, %v1849_v36  ;;  %v1139_v59 = vadd.f32 %v2777_v27, %v1100_v61  ;;  %v1579_v21 = vpop.f32.mrb[18].mxu1 }
 0x266   :  { %v1132_v50 = vadd.f32 %v2777_v27, %v1093_v16  ;;  %v1853_v12 = vpop.eup %1852  ;;  %1872 = vrcp.f32 %v1263_v35  ;;  %v1264_v32 = vadd.f32 1.0, %v1851_v43  ;;  %v1101_v57 = vadd.f32 %v1069_v2, %v2718_v4  ;;  %v1580_v11 = vpop.f32.mrb[19].mxu1 }
 0x267   :  { %v1438_v42 = vmul.f32 -1.442695, %v1131_v40  ;;  %v1855_v48 = vpop.eup %1854  ;;  %1349 = vst [vmem:[#allocation8] sm:$0xff] %v1853_v12  ;;  %1874 = vrcp.f32 %v1256_v26  ;;  %v1446_v55 = vmul.f32 -1.442695, %v1139_v59  ;;  %v1578_v33 = vadd.f32 %v1577_v63, %v1576_v20 }
 0x268   :  { %v1439_v58 = vmul.f32 -1.442695, %v1132_v50  ;;  %v1857_v34 = vpop.eup %1856  ;;  %1357 = vst [vmem:[#allocation8 + $0x40] sm:$0xff] %v1855_v48  ;;  %1876 = vrcp.f32 %v1264_v32  ;;  %v1140_v56 = vadd.f32 %v2777_v27, %v1101_v57  ;;  %v1581_v24 = vadd.f32 %v1580_v11, %v1579_v21  ;;  %v2921_v11 = vpop.xlane.xlu0 %845 }
 0x269   :  { %v1859_v29 = vpop.eup %1858  ;;  %v1040_v60 = vmul.f32 0.8, %v3115_v25  ;;  %1350 = vst [vmem:[#allocation8 + $0x8] sm:$0xff] %v1857_v34  ;;  %1878 = vpow2.f32 %v1438_v42  ;;  %v1008_v4 = vsel %vm880_vm0, %v963_v0, 0.0  ;;  %v1070_v22 = vmul.f32 %v1578_v33, %v2830_v44  ;;  %v2900_v44 = vpop.xlane.xlu1 %842 }
 0x26a   :  { %v1861_v9 = vpop.eup %1860  ;;  %1358 = vst [vmem:[#allocation8 + $0x48] sm:$0xff] %v1859_v29  ;;  %1880 = vpow2.f32 %v1446_v55  ;;  %v1447_v15 = vmul.f32 -1.442695, %v1140_v56  ;;  %v1009_v1 = vsel %vm881_vm1, %v965_v23, 0.0  ;;  %v1071_v19 = vmul.f32 %v1581_v24, %v2850_v6 }
 0x26b   :  { %v1863_v51 = vpop.eup %1862  ;;  %v1257_v28 = vadd.f32 1.0, %v1861_v9  ;;  %1882 = vpow2.f32 %v1439_v58  ;;  %v1102_v17 = vadd.f32 %v1070_v22, %v2727_v53  ;;  %v967_v13 = vmul.f32 0.2, %v2861_v46  ;;  %v1582_v30 = vpop.f32.mrb[20].mxu1 }
 0x26c   :  { %v1865_v5 = vpop.eup %1864  ;;  %v1265_v3 = vadd.f32 1.0, %v1863_v51  ;;  %1884 = vpow2.f32 %v1447_v15  ;;  %v1103_v39 = vadd.f32 %v1071_v19, %v2724_v38  ;;  %v1583_v18 = vpop.f32.mrb[21].mxu1  ;;  %vm886_vm8 = vcmp.gt.f32.partialorder %v2893_v54, 0.0 }
 0x26d   :  { %v1867_v14 = vpop.eup %1866  ;;  %1886 = vrcp.f32 %v1257_v28  ;;  %v1258_v6 = vadd.f32 1.0, %v1865_v5  ;;  %v1141_v45 = vadd.f32 %v2777_v27, %v1102_v17  ;;  %v1584_v47 = vadd.f32 %v1583_v18, %v1582_v30  ;;  %v1585_v53 = vpop.f32.mrb[22].mxu1 }
 0x26e   :  { %v2905_v0 = vpop.eup %1868  ;;  %1888 = vrcp.f32 %v1265_v3  ;;  %v1266_v46 = vadd.f32 1.0, %v1867_v14  ;;  %v1142_v23 = vadd.f32 %v2777_v27, %v1103_v39  ;;  %v1586_v31 = vpop.f32.mrb[23].mxu1  ;;  %vm887_vm9 = vcmp.gt.f32.partialorder %v2900_v44, 0.0 }
 0x26f   :  { %v1871_v38 = vpop.eup %1870  ;;  %1890 = vrcp.f32 %v1258_v6  ;;  %v1448_v7 = vmul.f32 -1.442695, %v1141_v45  ;;  %v1072_v61 = vmul.f32 %v1584_v47, %v1008_v4  ;;  %v1587_v16 = vadd.f32 %v1586_v31, %v1585_v53  ;;  %v2916_v50 = vpop.xlane.xlu1 %848 }
 0x270   :  { %v1873_v20 = vpop.eup %1872  ;;  %1351 = vst [vmem:[#allocation8 + $0x10] sm:$0xff] %v1871_v38  ;;  %1892 = vrcp.f32 %v1266_v46  ;;  %v1449_v36 = vmul.f32 -1.442695, %v1142_v23  ;;  %v969_v35 = vmul.f32 0.2, %v2865_v52  ;;  %v918_v40 = vsel %vm886_vm8, %v2893_v54, 1.0  ;;  %v2940_v53 = vpop.xlane.xlu0 %851 }
 0x271   :  { %v1875_v2 = vpop.eup %1874  ;;  %1359 = vst [vmem:[#allocation8 + $0x50] sm:$0xff] %v1873_v20  ;;  %1894 = vpow2.f32 %v1448_v7  ;;  %v1104_v63 = vadd.f32 %v1072_v61, %v1040_v60  ;;  %v1073_v43 = vmul.f32 %v1587_v16, %v1009_v1  ;;  %v919_v26 = vsel %vm887_vm9, %v2900_v44, 1.0  ;;  %v3116_v52 = vld [vmem:[#allocation24_spill] sm:$0xff] }
 0x272   :  { %v1877_v59 = vpop.eup %1876  ;;  %1352 = vst [vmem:[#allocation8 + $0x18] sm:$0xff] %v1875_v2  ;;  %1896 = vpow2.f32 %v1449_v36  ;;  %v1042_v12 = vmul.f32 0.8, %v3116_v52  ;;  %v1010_v58 = vsel %vm882_vm3, %v967_v13, 0.0  ;;  %v1011_v33 = vsel %vm883_vm4, %v969_v35, 0.0  ;;  %v3117_v13 = vld [vmem:[#allocation23_spill] sm:$0xff] }
 0x273   :  { %v1879_v21 = vpop.eup %1878  ;;  %1360 = vst [vmem:[#allocation8 + $0x58] sm:$0xff] %v1877_v59  ;;  %v1143_v32 = vadd.f32 %v2777_v27, %v1104_v63  ;;  %v1105_v42 = vadd.f32 %v1073_v43, %v2886_v41  ;;  %v1588_v57 = vpop.f32.mrb[24].mxu1  ;;  %1898 = vrcp.f32 %v918_v40  ;;  %vm889_vm10 = vcmp.gt.f32.partialorder %v2916_v50, 0.0  ;;  %v3118_v43 = vld [vmem:[#allocation26_spill] sm:$0xff] }
 0x274   :  { %v1881_v48 = vpop.eup %1880  ;;  %v1259_v55 = vadd.f32 1.0, %v1879_v21  ;;  %v1589_v34 = vpop.f32.mrb[25].mxu1  ;;  %1900 = vrcp.f32 %v919_v26  ;;  %vm888_vm11 = vcmp.gt.f32.partialorder %v2921_v11, 0.0  ;;  %v971_v51 = vmul.f32 0.2, %v2870_v8 }
 0x275   :  { %v1883_v56 = vpop.eup %1882  ;;  %v1267_v24 = vadd.f32 1.0, %v1881_v48  ;;  %v1144_v29 = vadd.f32 %v2777_v27, %v1105_v42  ;;  %v1590_v25 = vadd.f32 %v1589_v34, %v1588_v57  ;;  %v1591_v41 = vpop.f32.mrb[26].mxu1  ;;  %v1450_v22 = vmul.f32 -1.442695, %v1143_v32  ;;  %v3119_v57 = vld [vmem:[#allocation25_spill] sm:$0xff] }
 0x276   :  { %v1885_v60 = vpop.eup %1884  ;;  %1902 = vrcp.f32 %v1259_v55  ;;  %v1260_v4 = vadd.f32 1.0, %v1883_v56  ;;  %v1592_v9 = vpop.f32.mrb[27].mxu1  ;;  %v1043_v30 = vmul.f32 0.8, %v3117_v13  ;;  %v921_v3 = vsel %vm889_vm10, %v2916_v50, 1.0 }
 0x277   :  { %v1887_v62 = vpop.eup %1886  ;;  %1904 = vrcp.f32 %v1267_v24  ;;  %v1268_v49 = vadd.f32 1.0, %v1885_v60  ;;  %v1451_v15 = vmul.f32 -1.442695, %v1144_v29  ;;  %v1074_v1 = vmul.f32 %v1590_v25, %v1010_v58  ;;  %v2944_v7 = vpop.xlane.xlu1 %854 }
 0x278   :  { %v1889_v19 = vpop.eup %1888  ;;  %1353 = vst [vmem:[#allocation8 + $0x20] sm:$0xff] %v1887_v62  ;;  %1906 = vrcp.f32 %v1260_v4  ;;  %v1593_v28 = vadd.f32 %v1592_v9, %v1591_v41  ;;  %v973_v18 = vmul.f32 0.2, %v2905_v0  ;;  %v920_v8 = vsel %vm888_vm11, %v2921_v11, 1.0  ;;  %v2962_v41 = vpop.xlane.xlu0 %857 }
 0x279   :  { %v1891_v17 = vpop.eup %1890  ;;  %1361 = vst [vmem:[#allocation8 + $0x60] sm:$0xff] %v1889_v19  ;;  %1908 = vrcp.f32 %v1268_v49  ;;  %v1106_v5 = vadd.f32 %v1074_v1, %v1042_v12  ;;  %v1012_v31 = vsel %vm884_vm5, %v971_v51, 0.0  ;;  %vm890_vm12 = vcmp.gt.f32.partialorder %v2940_v53, 0.0 }
 0x27a   :  { %v1893_v39 = vpop.eup %1892  ;;  %1354 = vst [vmem:[#allocation8 + $0x28] sm:$0xff] %v1891_v17  ;;  %1910 = vpow2.f32 %v1450_v22  ;;  %v1075_v14 = vmul.f32 %v1593_v28, %v1011_v33  ;;  %v1013_v2 = vsel %vm885_vm7, %v973_v18, 0.0  ;;  %v1044_v26 = vmul.f32 0.8, %v3118_v43  ;;  %v3120_v22 = vld [vmem:[#allocation28_spill] sm:$0xff] }
 0x27b   :  { %v1895_v6 = vpop.eup %1894  ;;  %1362 = vst [vmem:[#allocation8 + $0x68] sm:$0xff] %v1893_v39  ;;  %1912 = vpow2.f32 %v1451_v15  ;;  %v1145_v45 = vadd.f32 %v2777_v27, %v1106_v5  ;;  %v1594_v47 = vpop.f32.mrb[28].mxu1  ;;  %vm891_vm13 = vcmp.gt.f32.partialorder %v2944_v7, 0.0  ;;  %v1045_v37 = vmul.f32 0.8, %v3119_v57 }
 0x27c   :  { %v1897_v46 = vpop.eup %1896  ;;  %v1269_v23 = vadd.f32 1.0, %v1895_v6  ;;  %v1107_v38 = vadd.f32 %v1075_v14, %v1043_v30  ;;  %1914 = vrcp.f32 %v921_v3  ;;  %v1595_v0 = vpop.f32.mrb[29].mxu1  ;;  %v922_v55 = vsel %vm890_vm12, %v2940_v53, 1.0  ;;  %v3121_v6 = vld [vmem:[#allocation27_spill] sm:$0xff] }
 0x27d   :  { %v1899_v61 = vpop.eup %1898  ;;  %v1270_v16 = vadd.f32 1.0, %v1897_v46  ;;  %v1452_v20 = vmul.f32 -1.442695, %v1145_v45  ;;  %1916 = vrcp.f32 %v920_v8  ;;  %v1596_v36 = vadd.f32 %v1595_v0, %v1594_v47  ;;  %v1597_v35 = vpop.f32.mrb[30].mxu1 }
 0x27e   :  { %v1901_v40 = vpop.eup %1900  ;;  %1918 = vrcp.f32 %v1269_v23  ;;  %v1146_v63 = vadd.f32 %v2777_v27, %v1107_v38  ;;  %v1598_v10 = vpop.f32.mrb[31].mxu1  ;;  %v975_v12 = vmul.f32 0.2, %v1899_v61  ;;  %v923_v29 = vsel %vm891_vm13, %v2944_v7, 1.0 }
 0x27f   :  { %1920 = vrcp.f32 %v1270_v16  ;;  %v1076_v59 = vmul.f32 %v1596_v36, %v1012_v31  ;;  %v1599_v21 = vadd.f32 %v1598_v10, %v1597_v35  ;;  %v2956_v34 = vpop.xlane.xlu1 %860  ;;  %v1046_v9 = vmul.f32 0.8, %v3120_v22 }
 0x280   :  { %v1903_v52 = vpop.eup %1902  ;;  %1922 = vpow2.f32 %v1452_v20  ;;  %v1453_v32 = vmul.f32 -1.442695, %v1146_v63  ;;  %v977_v62 = vmul.f32 0.2, %v1901_v40  ;;  %v1014_v49 = vsel %vm886_vm8, %v975_v12, 0.0 }
 0x281   :  { %v1905_v42 = vpop.eup %1904  ;;  %1355 = vst [vmem:[#allocation8 + $0x30] sm:$0xff] %v1903_v52  ;;  %v1108_v48 = vadd.f32 %v1076_v59, %v1044_v26  ;;  %v1077_v58 = vmul.f32 %v1599_v21, %v1013_v2  ;;  %vm893_vm14 = vcmp.gt.f32.partialorder %v2956_v34, 0.0  ;;  %vm892_vm15 = vcmp.gt.f32.partialorder %v2962_v41, 0.0 }
 0x282   :  { %v1907_v33 = vpop.eup %1906  ;;  %1363 = vst [vmem:[#allocation8 + $0x70] sm:$0xff] %v1905_v42  ;;  %1924 = vpow2.f32 %v1453_v32  ;;  %v1047_v45 = vmul.f32 0.8, %v3121_v6  ;;  %v1015_v47 = vsel %vm887_vm9, %v977_v62, 0.0  ;;  %v924_v23 = vsel %vm892_vm15, %v2962_v41, 1.0 }
 0x283   :  { %v1909_v56 = vpop.eup %1908  ;;  %1356 = vst [vmem:[#allocation8 + $0x38] sm:$0xff] %v1907_v33  ;;  %v1147_v24 = vadd.f32 %v2777_v27, %v1108_v48  ;;  %v1109_v25 = vadd.f32 %v1077_v58, %v1045_v37  ;;  %v1600_v60 = vpop.f32.mrb[32].mxu1  ;;  %1926 = vrcp.f32 %v922_v55  ;;  %v925_v61 = vsel %vm893_vm14, %v2956_v34, 1.0  ;;  %v3122_v48 = vld [vmem:[#allocation30_spill] sm:$0xff] }
 0x284   :  { %v1911_v4 = vpop.eup %1910  ;;  %1364 = vst [vmem:[#allocation8 + $0x78] sm:$0xff] %v1909_v56  ;;  %v1601_v15 = vpop.f32.mrb[33].mxu1  ;;  %1928 = vrcp.f32 %v923_v29  ;;  %v1048_v55 = vmul.f32 0.8, %v3122_v48 }
 0x285   :  { %v1913_v1 = vpop.eup %1912  ;;  %v1271_v19 = vadd.f32 1.0, %v1911_v4  ;;  %v1454_v51 = vmul.f32 -1.442695, %v1147_v24  ;;  %v1148_v28 = vadd.f32 %v2777_v27, %v1109_v25  ;;  %v1602_v17 = vadd.f32 %v1601_v15, %v1600_v60  ;;  %v1603_v13 = vpop.f32.mrb[34].mxu1  ;;  %v3123_v24 = vld [vmem:[#allocation29_spill] sm:$0xff] }
 0x286   :  { %v1915_v30 = vpop.eup %1914  ;;  %v1272_v5 = vadd.f32 1.0, %v1913_v1  ;;  %v1604_v3 = vpop.f32.mrb[35].mxu1  ;;  %v1049_v29 = vmul.f32 0.8, %v3123_v24 }
 0x287   :  { %v1917_v39 = vpop.eup %1916  ;;  %1930 = vrcp.f32 %v1271_v19  ;;  %v1455_v54 = vmul.f32 -1.442695, %v1148_v28  ;;  %v1078_v18 = vmul.f32 %v1602_v17, %v1014_v49  ;;  %v1605_v14 = vadd.f32 %v1604_v3, %v1603_v13 }
 0x288   :  { %v1919_v8 = vpop.eup %1918  ;;  %1932 = vrcp.f32 %v1272_v5  ;;  %v979_v20 = vmul.f32 0.2, %v1917_v39  ;;  %v981_v2 = vmul.f32 0.2, %v1915_v30  ;;  %v3124_v5 = vld [vmem:[#allocation32_spill] sm:$0xff] }
 0x289   :  { %v1921_v46 = vpop.eup %1920  ;;  %1365 = vst [vmem:[#allocation8 + $0x80] sm:$0xff] %v1919_v8  ;;  %1934 = vpow2.f32 %v1454_v51  ;;  %v1110_v31 = vadd.f32 %v1078_v18, %v1046_v9  ;;  %v1079_v38 = vmul.f32 %v1605_v14, %v1015_v47  ;;  %v1050_v3 = vmul.f32 0.8, %v3124_v5 }
 0x28a   :  { %v1923_v0 = vpop.eup %1922  ;;  %1366 = vst [vmem:[#allocation8 + $0x88] sm:$0xff] %v1921_v46  ;;  %1936 = vpow2.f32 %v1455_v54  ;;  %v1016_v32 = vsel %vm888_vm11, %v979_v20, 0.0  ;;  %v1017_v58 = vsel %vm889_vm10, %v981_v2, 0.0 }
 0x28b   :  { %v1273_v16 = vadd.f32 1.0, %v1923_v0  ;;  %v1149_v44 = vadd.f32 %v2777_v27, %v1110_v31  ;;  %v1111_v36 = vadd.f32 %v1079_v38, %v1047_v45  ;;  %v1606_v35 = vpop.f32.mrb[36].mxu1  ;;  %1938 = vrcp.f32 %v924_v23  ;;  %v3125_v31 = vld [vmem:[#allocation31_spill] sm:$0xff] }
 0x28c   :  { %v1925_v40 = vpop.eup %1924  ;;  %v1607_v63 = vpop.f32.mrb[37].mxu1  ;;  %v1051_v38 = vmul.f32 0.8, %v3125_v31 }
 0x28d   :  { %1940 = vrcp.f32 %v1273_v16  ;;  %v1274_v10 = vadd.f32 1.0, %v1925_v40  ;;  %v1456_v43 = vmul.f32 -1.442695, %v1149_v44  ;;  %v1150_v26 = vadd.f32 %v2777_v27, %v1111_v36  ;;  %v1609_v59 = vpop.f32.mrb[38].mxu1  ;;  %v1927_v21 = vpop.eup %1926 }
 0x28e   :  { %1942 = vrcp.f32 %v925_v61  ;;  %v1608_v52 = vadd.f32 %v1607_v63, %v1606_v35  ;;  %v1610_v12 = vpop.f32.mrb[39].mxu1  ;;  %v1929_v37 = vpop.eup %1928  ;;  %v983_v4 = vmul.f32 0.2, %v1927_v21  ;;  %v3126_v21 = vld [vmem:[#allocation34_spill] sm:$0xff] }
 0x28f   :  { %1944 = vrcp.f32 %v1274_v10  ;;  %v1457_v42 = vmul.f32 -1.442695, %v1150_v26  ;;  %v1611_v57 = vadd.f32 %v1610_v12, %v1609_v59  ;;  %v985_v1 = vmul.f32 0.2, %v1929_v37 }
 0x290   :  { %1946 = vpow2.f32 %v1456_v43  ;;  %v1080_v33 = vmul.f32 %v1608_v52, %v1016_v32  ;;  %v1018_v39 = vsel %vm890_vm12, %v983_v4, 0.0  ;;  %v1052_v52 = vmul.f32 0.8, %v3126_v21 }
 0x291   :  { %v1931_v56 = vpop.eup %1930  ;;  %1948 = vpow2.f32 %v1457_v42  ;;  %v1081_v25 = vmul.f32 %v1611_v57, %v1017_v58  ;;  %v1019_v46 = vsel %vm891_vm13, %v985_v1, 0.0 }
 0x292   :  { %v1933_v60 = vpop.eup %1932  ;;  %1367 = vst [vmem:[#allocation8 + $0x90] sm:$0xff] %v1931_v56  ;;  %v1112_v11 = vadd.f32 %v1080_v33, %v1048_v55  ;;  %v3127_v33 = vld [vmem:[#allocation33_spill] sm:$0xff] }
 0x293   :  { %v1935_v22 = vpop.eup %1934  ;;  %1368 = vst [vmem:[#allocation8 + $0x98] sm:$0xff] %v1933_v60  ;;  %v1113_v9 = vadd.f32 %v1081_v25, %v1049_v29  ;;  %v1612_v62 = vpop.f32.mrb[40].mxu1  ;;  %v1053_v56 = vmul.f32 0.8, %v3127_v33 }
 0x294   :  { %v1937_v49 = vpop.eup %1936  ;;  %v1275_v15 = vadd.f32 1.0, %v1935_v22  ;;  %v1151_v50 = vadd.f32 %v2777_v27, %v1112_v11  ;;  %v1613_v19 = vpop.f32.mrb[41].mxu1 }
 0x295   :  { %v1276_v51 = vadd.f32 1.0, %v1937_v49  ;;  %v1152_v28 = vadd.f32 %v2777_v27, %v1113_v9  ;;  %v1614_v17 = vadd.f32 %v1613_v19, %v1612_v62  ;;  %v1615_v13 = vpop.f32.mrb[42].mxu1  ;;  %v1939_v30 = vpop.eup %1938 }
 0x296   :  { %1950 = vrcp.f32 %v1275_v15  ;;  %v1458_v54 = vmul.f32 -1.442695, %v1151_v50  ;;  %v1616_v18 = vpop.f32.mrb[43].mxu1  ;;  %v987_v16 = vmul.f32 0.2, %v1939_v30 }
 0x297   :  { %v1941_v14 = vpop.eup %1940  ;;  %1952 = vrcp.f32 %v1276_v51  ;;  %v1459_v8 = vmul.f32 -1.442695, %v1152_v28  ;;  %v1082_v6 = vmul.f32 %v1614_v17, %v1018_v39  ;;  %v1617_v45 = vadd.f32 %v1616_v18, %v1615_v13 }
 0x298   :  { %v1943_v47 = vpop.eup %1942  ;;  %1369 = vst [vmem:[#allocation8 + $0xa0] sm:$0xff] %v1941_v14  ;;  %1954 = vpow2.f32 %v1458_v54  ;;  %v1020_v12 = vsel %vm892_vm15, %v987_v16, 0.0 }
 0x299   :  { %v1945_v23 = vpop.eup %1944  ;;  %1956 = vpow2.f32 %v1459_v8  ;;  %v1114_v0 = vadd.f32 %v1082_v6, %v1050_v3  ;;  %v1083_v53 = vmul.f32 %v1617_v45, %v1019_v46  ;;  %v989_v2 = vmul.f32 0.2, %v1943_v47 }
 0x29a   :  { %v1947_v61 = vpop.eup %1946  ;;  %1370 = vst [vmem:[#allocation8 + $0xa8] sm:$0xff] %v1945_v23 }
 0x29b   :  { %v1949_v20 = vpop.eup %1948  ;;  %v1277_v44 = vadd.f32 1.0, %v1947_v61  ;;  %v1153_v36 = vadd.f32 %v2777_v27, %v1114_v0  ;;  %v1115_v35 = vadd.f32 %v1083_v53, %v1051_v38  ;;  %v1618_v40 = vpop.f32.mrb[44].mxu1  ;;  %v1021_v55 = vsel %vm893_vm14, %v989_v2, 0.0 }
 0x29c   :  { %v1278_v63 = vadd.f32 1.0, %v1949_v20  ;;  %v1619_v7 = vpop.f32.mrb[45].mxu1 }
 0x29d   :  { %1958 = vrcp.f32 %v1277_v44  ;;  %v1460_v10 = vmul.f32 -1.442695, %v1153_v36  ;;  %v1154_v43 = vadd.f32 %v2777_v27, %v1115_v35  ;;  %v1620_v26 = vadd.f32 %v1619_v7, %v1618_v40  ;;  %v1621_v59 = vpop.f32.mrb[46].mxu1 }
 0x29e   :  { %1960 = vrcp.f32 %v1278_v63  ;;  %v1622_v32 = vpop.f32.mrb[47].mxu1 }
 0x29f   :  { %1962 = vpow2.f32 %v1460_v10  ;;  %v1461_v42 = vmul.f32 -1.442695, %v1154_v43  ;;  %v1084_v57 = vmul.f32 %v1620_v26, %v1020_v12  ;;  %v1623_v37 = vadd.f32 %v1622_v32, %v1621_v59 }
 0x2a0   :  { %v1951_v48 = vpop.eup %1950 }
 0x2a1   :  { %v1953_v58 = vpop.eup %1952  ;;  %1371 = vst [vmem:[#allocation8 + $0xb0] sm:$0xff] %v1951_v48  ;;  %1964 = vpow2.f32 %v1461_v42  ;;  %v1116_v24 = vadd.f32 %v1084_v57, %v1052_v52  ;;  %v1085_v29 = vmul.f32 %v1623_v37, %v1021_v55 }
 0x2a2   :  { %v1955_v25 = vpop.eup %1954  ;;  %1372 = vst [vmem:[#allocation8 + $0xb8] sm:$0xff] %v1953_v58 }
 0x2a3   :  { %v1957_v41 = vpop.eup %1956  ;;  %v1279_v60 = vadd.f32 1.0, %v1955_v25  ;;  %v1155_v4 = vadd.f32 %v2777_v27, %v1116_v24  ;;  %v1117_v11 = vadd.f32 %v1085_v29, %v1053_v56 }
 0x2a4   :  { %v1280_v22 = vadd.f32 1.0, %v1957_v41 }
 0x2a5   :  { %1966 = vrcp.f32 %v1279_v60  ;;  %v1462_v9 = vmul.f32 -1.442695, %v1155_v4  ;;  %v1156_v34 = vadd.f32 %v2777_v27, %v1117_v11 }
 0x2a6   :  { %1968 = vrcp.f32 %v1280_v22 }
 0x2a7   :  { %v1959_v62 = vpop.eup %1958  ;;  %1970 = vpow2.f32 %v1462_v9  ;;  %v1463_v49 = vmul.f32 -1.442695, %v1156_v34 }
 0x2a8   :  { %v1961_v15 = vpop.eup %1960  ;;  %1373 = vst [vmem:[#allocation8 + $0xc0] sm:$0xff] %v1959_v62 }
 0x2a9   :  { %v1963_v1 = vpop.eup %1962  ;;  %1374 = vst [vmem:[#allocation8 + $0xc8] sm:$0xff] %v1961_v15  ;;  %1972 = vpow2.f32 %v1463_v49 }
 0x2aa   :  { %v1281_v50 = vadd.f32 1.0, %v1963_v1 }
 0x2ab   :  { %v1965_v19 = vpop.eup %1964 }
 0x2ac   :  { %1974 = vrcp.f32 %v1281_v50  ;;  %v1282_v51 = vadd.f32 1.0, %v1965_v19 }
 0x2ae   :  { %1976 = vrcp.f32 %v1282_v51 }
 0x2af   :  { %v1967_v28 = vpop.eup %1966 }
 0x2b0   :  { %v1969_v17 = vpop.eup %1968  ;;  %1375 = vst [vmem:[#allocation8 + $0xd0] sm:$0xff] %v1967_v28 }
 0x2b1   :  { %v1971_v13 = vpop.eup %1970  ;;  %1376 = vst [vmem:[#allocation8 + $0xd8] sm:$0xff] %v1969_v17 }
 0x2b2   :  { %v1283_v27 = vadd.f32 1.0, %v1971_v13 }
 0x2b3   :  { %v1973_v30 = vpop.eup %1972 }
 0x2b4   :  { %1978 = vrcp.f32 %v1283_v27  ;;  %v1284_v5 = vadd.f32 1.0, %v1973_v30 }
 0x2b6   :  { %v1975_v3 = vpop.eup %1974  ;;  %1980 = vrcp.f32 %v1284_v5 }
 0x2b7   :  { %1377 = vst [vmem:[#allocation8 + $0xe0] sm:$0xff] %v1975_v3 }
 0x2b8   :  { %v1977_v39 = vpop.eup %1976 }
 0x2b9   :  { %1378 = vst [vmem:[#allocation8 + $0xe8] sm:$0xff] %v1977_v39 }
 0x2be   :  { %v1979_v54 = vpop.eup %1978 }
 0x2bf   :  { %1379 = vst [vmem:[#allocation8 + $0xf0] sm:$0xff] %v1979_v54 }
 0x2c0   :  { %v1981_v18 = vpop.eup %1980 }
 0x2c1   :  { %1380 = vst [vmem:[#allocation8 + $0xf8] sm:$0xff] %v1981_v18 }
 0x2c2   :  { %2059 = shalt.err (!%p2056_p0)
}
 0x2c3   :  { %s2060_s6 = scalar_lea.hbm %s3024_s4, 4096 }
 0x2c4   :  { %p2061_p1 = scmp.ne.s32.totalorder %s3024_s4, %s2060_s6  ;;  %p2064_p2 = scmp.lt.u32.totalorder %s2060_s6, %s3024_s4 }
 0x2c6   :  { %p2066_p3 = pnand %p2064_p2, %p2061_p1 }
 0x2c8   :  { %2069 = shalt.err (!%p2066_p3)
}
 0x2c9   :  { %1392 = dma.vmem_to_hbm [thread:$0]  %s1387_s26, 4096, %s3024_s4, [#allocation4], %s2078_s27, %s2078_s27, %s2079_s28  }
 0x2ca   :  { %2074 = dma.done.wait [#allocation4], 4096  }
 0x2cb   :  { %2075 = vsyncadd [#allocation4], 4294963200 }
 0x2cc   :  { %1396 = vsyncpa [#allocation3], 1 }
 0x2cd   :  { %1397 = vsyncpa [#allocation6], 1 }
 0x2ce   :  { %1398 = vsyncpa [#allocation4], 1 }

</bundles_post_ra>
